<compile_context>
chip_gen: v7x
topology: tpu7x:2x2x1
jax: 0.10.0
libtpu: 0.0.40
codegen_flags: <defaults>
</compile_context>

<pallas_src>
import functools
import math

import jax
import jax.numpy as jnp
from jax.experimental import pallas as pl
from jax.experimental.pallas import tpu as pltpu

EPS = 1e-6


# ---------------------------------------------------------------------------
# LayerNorm matching the torch module: unbiased std (ddof=1), divide by (std+eps)
# ---------------------------------------------------------------------------
def _layer_norm_ref(x, a, b, eps=EPS):
    d = x.shape[-1]
    mean = jnp.mean(x, axis=-1, keepdims=True)
    var = jnp.sum((x - mean) ** 2, axis=-1, keepdims=True) / (d - 1)
    return a * (x - mean) / (jnp.sqrt(var) + eps) + b


def _layer_norm_in_kernel(x, a, b, eps=EPS):
    # Exact divide: approx reciprocal error would compound through the residual
    # stream across N layers (review feedback).
    d = x.shape[-1]
    mean = jnp.mean(x, axis=-1, keepdims=True)
    var = jnp.sum((x - mean) ** 2, axis=-1, keepdims=True) * (1.0 / (d - 1))
    return a * (x - mean) / (jnp.sqrt(var) + eps) + b


# ---------------------------------------------------------------------------
# Fused kernel: grid = (batch_block, layer)
# ---------------------------------------------------------------------------
def encoder_stack_kernel(x_ref,
                         wq_ref, bq_ref, wk_ref, bk_ref, wv_ref, bv_ref,
                         wo_ref, bo_ref, ln1a_ref, ln1b_ref,
                         w1_ref, b1_ref, w2_ref, b2_ref, ln2a_ref, ln2b_ref,
                         lnfa_ref, lnfb_ref,
                         o_ref,
                         act_ref,
                         *, h, d_k, tb, seq):
    layer = pl.program_id(1)
    n_layers = pl.num_programs(1)
    d_model = act_ref.shape[-1]
    m = tb * seq                                  # matmul M dimension (TB*S)

    # First layer of each batch block: pull the input into the VMEM-resident
    # activation scratch; later layers reuse what the previous layer wrote.
    @pl.when(layer == 0)
    def _():
        act_ref[...] = x_ref[...].reshape(m, d_model)

    x = act_ref[...]                              # (M, D) float32

    # ---------------- self-attention sublayer: x + MHA(LN(x)) ----------------
    ln_x = _layer_norm_in_kernel(x, ln1a_ref[0], ln1b_ref[0])
    ln_b16 = ln_x.astype(jnp.bfloat16)
    scale = 1.0 / math.sqrt(d_k)

    attn = jnp.zeros((m, d_model), jnp.float32)   # Wo folded into the head loop
    for hi in range(h):                           # static unroll (small h)
        # Per-head weight slabs are free major-dim views of the packed refs
        # (no lane slicing of activations, no masked narrow stores).
        qh = jnp.dot(ln_b16, wq_ref[0, hi],
                     preferred_element_type=jnp.float32) + bq_ref[0, hi]
        kh = jnp.dot(ln_b16, wk_ref[0, hi],
                     preferred_element_type=jnp.float32) + bk_ref[0, hi]
        vh = jnp.dot(ln_b16, wv_ref[0, hi],
                     preferred_element_type=jnp.float32) + bv_ref[0, hi]

        # Fold the 1/sqrt(d_k) score scale into q, then go bf16 for the MXU.
        qh = (qh * scale).astype(jnp.bfloat16).reshape(tb, seq, d_k)
        kh = kh.astype(jnp.bfloat16).reshape(tb, seq, d_k)
        vh = vh.astype(jnp.bfloat16).reshape(tb, seq, d_k)

        # Scores/softmax stay per batch element (batched einsum over TB).
        s = jnp.einsum("bqd,bkd->bqk", qh, kh,
                       preferred_element_type=jnp.float32)
        s = s - jnp.max(s, axis=-1, keepdims=True)       # stable softmax
        e = jnp.exp(s)
        p = e * pl.reciprocal(jnp.sum(e, axis=-1, keepdims=True), approx=True)

        ctx = jnp.einsum("bqk,bkd->bqd", p.astype(jnp.bfloat16), vh,
                         preferred_element_type=jnp.float32)
        ctx = ctx.reshape(m, d_k).astype(jnp.bfloat16)

        # Fold this head's slice of the output projection directly into the
        # f32 accumulator (equivalent to concat(heads) @ Wo).
        attn = attn + jnp.dot(ctx, wo_ref[0, hi],
                              preferred_element_type=jnp.float32)

    y = x + attn + bo_ref[0]                      # dropout == identity (eval)

    # ---------------- feed-forward sublayer: y + FFN(LN(y)) ------------------
    ln_y = _layer_norm_in_kernel(y, ln2a_ref[0], ln2b_ref[0])
    hdn = jnp.dot(ln_y.astype(jnp.bfloat16), w1_ref[0],
                  preferred_element_type=jnp.float32) + b1_ref[0]
    hdn = jnp.maximum(hdn, 0.0)
    ff = jnp.dot(hdn.astype(jnp.bfloat16), w2_ref[0],
                 preferred_element_type=jnp.float32) + b2_ref[0]
    y = y + ff

    # Keep the activation resident for the next layer of this batch block.
    act_ref[...] = y

    # Only the last layer touches HBM, with the final LayerNorm fused in.
    @pl.when(layer == n_layers - 1)
    def _():
        out = _layer_norm_in_kernel(y, lnfa_ref[...], lnfb_ref[...])
        o_ref[...] = out.reshape(tb, seq, d_model)


# ---------------------------------------------------------------------------
# Wrapper
# ---------------------------------------------------------------------------
def _pick_batch_block(batch, seq, target_m=512):
    """Largest divisor of `batch` keeping the matmul M = TB*S near the MXU sweet spot."""
    tb = 1
    for cand in range(1, batch + 1):
        if batch % cand == 0 and cand * seq <= target_m:
            tb = cand
    return tb


def encoder_stack_forward(x, packed, *, h, d_k, batch_block=None):
    B, S, D = x.shape
    N = packed["wq"].shape[0]
    tb = batch_block if batch_block is not None else _pick_batch_block(B, S)
    assert B % tb == 0, "batch must be divisible by the batch block"

    def stacked_spec(arr):      # (N, ...) array, select layer `l`
        if arr.ndim == 4:
            return pl.BlockSpec((1,) + arr.shape[1:], lambda b, l: (l, 0, 0, 0))
        return pl.BlockSpec((1,) + arr.shape[1:], lambda b, l: (l, 0, 0))

    operand_names = ("wq", "bq", "wk", "bk", "wv", "bv", "wo", "bo",
                     "ln1a", "ln1b", "w1", "b1", "w2", "b2", "ln2a", "ln2b")

    operands = [x]
    in_specs = [pl.BlockSpec((tb, S, D), lambda b, l: (b, 0, 0))]
    for name in operand_names:
        arr = packed[name]
        operands.append(arr)
        in_specs.append(stacked_spec(arr))
    for name in ("lnfa", "lnfb"):                 # shared final-LayerNorm params
        arr = packed[name]
        operands.append(arr)
        in_specs.append(pl.BlockSpec(arr.shape, lambda b, l: (0, 0)))

    kernel = functools.partial(encoder_stack_kernel, h=h, d_k=d_k, tb=tb, seq=S)
    return pl.pallas_call(
        kernel,
        out_shape=jax.ShapeDtypeStruct((B, S, D), jnp.float32),
        grid=(B // tb, N),
        in_specs=in_specs,
        out_specs=pl.BlockSpec((tb, S, D), lambda b, l: (b, 0, 0)),
        scratch_shapes=[
            pltpu.VMEM((tb * S, D), jnp.float32),    # resident activation
        ],
        compiler_params=pltpu.CompilerParams(
            dimension_semantics=("parallel", "arbitrary"),
            # Fits all generations (v5e/v6e: 128 MiB physical, v7x: 64 MiB).
            vmem_limit_bytes=48 * 1024 * 1024),
    )(*operands)


# ---------------------------------------------------------------------------
# Parameter init (torch-__init__ shapes, weights stored as (in, out)) + packing
# ---------------------------------------------------------------------------
def init_params(key, *, h, d_model, d_ff, N):
    def lin(k, fan_in, fan_out):
        return (jax.random.normal(k, (fan_in, fan_out), jnp.float32)
                / math.sqrt(fan_in)).astype(jnp.float32)

    def bias(k, n):
        return (0.01 * jax.random.normal(k, (n,), jnp.float32)).astype(jnp.float32)

    layers = []
    for i in range(N):
        ks = jax.random.split(jax.random.fold_in(key, i), 12)
        layers.append({
            "wq": lin(ks[0], d_model, d_model), "bq": bias(ks[1], d_model),
            "wk": lin(ks[2], d_model, d_model), "bk": bias(ks[3], d_model),
            "wv": lin(ks[4], d_model, d_model), "bv": bias(ks[5], d_model),
            "wo": lin(ks[6], d_model, d_model), "bo": bias(ks[7], d_model),
            "ln1a": jnp.ones((d_model,), jnp.float32),
            "ln1b": jnp.zeros((d_model,), jnp.float32),
            "w1": lin(ks[8], d_model, d_ff), "b1": bias(ks[9], d_ff),
            "w2": lin(ks[10], d_ff, d_model), "b2": bias(ks[11], d_model),
            "ln2a": jnp.ones((d_model,), jnp.float32),
            "ln2b": jnp.zeros((d_model,), jnp.float32),
        })
    return {
        "layers": layers,
        "ln_a": jnp.ones((d_model,), jnp.float32),
        "ln_b": jnp.zeros((d_model,), jnp.float32),
    }


def pack_params(params, *, h, d_k):
    """Stack per-layer params into (N, ...) arrays.

    Attention weights are pre-split per head along MAJOR dims so the kernel never
    slices activations along the lane dim:
      wq/wk/wv: (N, h, D, d_k)   (output features split per head)
      wo:       (N, h, d_k, D)   (input rows split per head -> Wo folded per head)
    Matmul weights go to bf16 for the MXU; biases / LN params stay f32.
    """
    layers = params["layers"]
    d_model = layers[0]["wq"].shape[0]

    def stack(fn):
        return jnp.stack([fn(lp) for lp in layers], 0)

    def head_w(name):   # (D, D) -> (h, D, d_k)
        return stack(lambda lp: lp[name].reshape(d_model, h, d_k)
                     .transpose(1, 0, 2)).astype(jnp.bfloat16)

    def head_b(name):   # (D,) -> (h, 1, d_k)
        return stack(lambda lp: lp[name].reshape(h, 1, d_k))

    def row(name):      # (dim,) -> (1, dim)
        return stack(lambda lp: lp[name][None, :])

    return {
        "wq": head_w("wq"), "wk": head_w("wk"), "wv": head_w("wv"),
        "bq": head_b("bq"), "bk": head_b("bk"), "bv": head_b("bv"),
        "wo": stack(lambda lp: lp["wo"].reshape(h, d_k, d_model)).astype(jnp.bfloat16),
        "bo": row("bo"),
        "ln1a": row("ln1a"), "ln1b": row("ln1b"),
        "w1": stack(lambda lp: lp["w1"]).astype(jnp.bfloat16), "b1": row("b1"),
        "w2": stack(lambda lp: lp["w2"]).astype(jnp.bfloat16), "b2": row("b2"),
        "ln2a": row("ln2a"), "ln2b": row("ln2b"),
        "lnfa": params["ln_a"][None, :],
        "lnfb": params["ln_b"][None, :],
    }


# ---------------------------------------------------------------------------
# Pure-JAX reference (mirrors the torch forward pass, eval mode, full f32)
# ---------------------------------------------------------------------------
def reference_forward(x, params, *, h, d_k):
    def mha(xn, p):
        q = xn @ p["wq"] + p["bq"]
        k = xn @ p["wk"] + p["bk"]
        v = xn @ p["wv"] + p["bv"]
        B, S, D = q.shape
        qh = q.reshape(B, S, h, d_k).transpose(0, 2, 1, 3)
        kh = k.reshape(B, S, h, d_k).transpose(0, 2, 1, 3)
        vh = v.reshape(B, S, h, d_k).transpose(0, 2, 1, 3)
        s = jnp.einsum("bhqd,bhkd->bhqk", qh, kh) / math.sqrt(d_k)
        p_attn = jax.nn.softmax(s, axis=-1)
        ctx = jnp.einsum("bhqk,bhkd->bhqd", p_attn, vh)
        ctx = ctx.transpose(0, 2, 1, 3).reshape(B, S, D)
        return ctx @ p["wo"] + p["bo"]

    y = x
    for p in params["layers"]:
        y = y + mha(_layer_norm_ref(y, p["ln1a"], p["ln1b"]), p)
        ln_y = _layer_norm_ref(y, p["ln2a"], p["ln2b"])
        y = y + (jnp.maximum(ln_y @ p["w1"] + p["b1"], 0.0) @ p["w2"] + p["b2"])
    return _layer_norm_ref(y, params["ln_a"], params["ln_b"])


# ---------------------------------------------------------------------------
if __name__ == "__main__":
    B, S = 2, 8
    H, D_MODEL, D_FF, N_LAYERS = 4, 32, 64, 2
    D_K = D_MODEL // H

    key = jax.random.PRNGKey(0)
    kx, kp = jax.random.split(key)
    x = jax.random.normal(kx, (B, S, D_MODEL), jnp.float32)
    params = init_params(kp, h=H, d_model=D_MODEL, d_ff=D_FF, N=N_LAYERS)
    packed = pack_params(params, h=H, d_k=D_K)

    out = encoder_stack_forward(x, packed, h=H, d_k=D_K)
    out = jax.block_until_ready(out)

    ref = reference_forward(x, params, h=H, d_k=D_K)
    assert out.shape == (B, S, D_MODEL)
    # bf16 matmuls (f32 accumulation) -> looser tolerance than pure f32.
    assert jnp.allclose(out, ref, atol=5e-2, rtol=5e-2), "mismatch vs JAX reference"

    print("KERNEL_OK")
</pallas_src>

<mosaic_0001>
module attributes {stable_mosaic.version = 11 : i64} {
  func.func @encoder_stack_kernel(%arg0: i32, %arg1: i32, %arg2: memref<2x8x32xf32, #tpu.memory_space<vmem>>, %arg3: memref<1x4x32x8xbf16, #tpu.memory_space<vmem>>, %arg4: memref<1x4x1x8xf32, #tpu.memory_space<vmem>>, %arg5: memref<1x4x32x8xbf16, #tpu.memory_space<vmem>>, %arg6: memref<1x4x1x8xf32, #tpu.memory_space<vmem>>, %arg7: memref<1x4x32x8xbf16, #tpu.memory_space<vmem>>, %arg8: memref<1x4x1x8xf32, #tpu.memory_space<vmem>>, %arg9: memref<1x4x8x32xbf16, #tpu.memory_space<vmem>>, %arg10: memref<1x1x32xf32, #tpu.memory_space<vmem>>, %arg11: memref<1x1x32xf32, #tpu.memory_space<vmem>>, %arg12: memref<1x1x32xf32, #tpu.memory_space<vmem>>, %arg13: memref<1x32x64xbf16, #tpu.memory_space<vmem>>, %arg14: memref<1x1x64xf32, #tpu.memory_space<vmem>>, %arg15: memref<1x64x32xbf16, #tpu.memory_space<vmem>>, %arg16: memref<1x1x32xf32, #tpu.memory_space<vmem>>, %arg17: memref<1x1x32xf32, #tpu.memory_space<vmem>>, %arg18: memref<1x1x32xf32, #tpu.memory_space<vmem>>, %arg19: memref<1x32xf32, #tpu.memory_space<vmem>>, %arg20: memref<1x32xf32, #tpu.memory_space<vmem>>, %arg21: memref<2x8x32xf32, #tpu.memory_space<vmem>>, %arg22: memref<16x32xf32, #tpu.memory_space<vmem>>) attributes {dimension_semantics = [#tpu.dimension_semantics<parallel>, #tpu.dimension_semantics<arbitrary>], iteration_bounds = array<i64: 1, 2>, scalar_prefetch = 0 : i64, scratch_operands = 1 : i64, tpu.core_type = #tpu.core_type<tc>, window_params = [{transform_indices = @transform_0, window_bounds = array<i64: 2, 8, 32>}, {transform_indices = @transform_1, window_bounds = array<i64: 1, 4, 32, 8>}, {transform_indices = @transform_2, window_bounds = array<i64: 1, 4, 1, 8>}, {transform_indices = @transform_3, window_bounds = array<i64: 1, 4, 32, 8>}, {transform_indices = @transform_4, window_bounds = array<i64: 1, 4, 1, 8>}, {transform_indices = @transform_5, window_bounds = array<i64: 1, 4, 32, 8>}, {transform_indices = @transform_6, window_bounds = array<i64: 1, 4, 1, 8>}, {transform_indices = @transform_7, window_bounds = array<i64: 1, 4, 8, 32>}, {transform_indices = @transform_8, window_bounds = array<i64: 1, 1, 32>}, {transform_indices = @transform_9, window_bounds = array<i64: 1, 1, 32>}, {transform_indices = @transform_10, window_bounds = array<i64: 1, 1, 32>}, {transform_indices = @transform_11, window_bounds = array<i64: 1, 32, 64>}, {transform_indices = @transform_12, window_bounds = array<i64: 1, 1, 64>}, {transform_indices = @transform_13, window_bounds = array<i64: 1, 64, 32>}, {transform_indices = @transform_14, window_bounds = array<i64: 1, 1, 32>}, {transform_indices = @transform_15, window_bounds = array<i64: 1, 1, 32>}, {transform_indices = @transform_16, window_bounds = array<i64: 1, 1, 32>}, {pipeline_mode = #tpu.pipeline_mode<synchronous>, transform_indices = @transform_17, window_bounds = array<i64: 1, 32>}, {pipeline_mode = #tpu.pipeline_mode<synchronous>, transform_indices = @transform_18, window_bounds = array<i64: 1, 32>}, {transform_indices = @transform_19, window_bounds = array<i64: 2, 8, 32>}]} {
    %c0_i32 = arith.constant 0 : i32
    %0 = arith.cmpi eq, %arg1, %c0_i32 : i32
    %1 = arith.extui %0 : i1 to i32
    %c0_i32_0 = arith.constant 0 : i32
    %2 = arith.cmpi ne, %1, %c0_i32_0 : i32
    scf.if %2 {
      %c0_190 = arith.constant 0 : index
      %c0_191 = arith.constant 0 : index
      %c0_192 = arith.constant 0 : index
      %278 = vector.load %arg2[%c0_190, %c0_191, %c0_192] : memref<2x8x32xf32, #tpu.memory_space<vmem>>, vector<2x8x32xf32>
      %279 = vector.shape_cast %278 : vector<2x8x32xf32> to vector<16x32xf32>
      %c0_193 = arith.constant 0 : index
      %c0_194 = arith.constant 0 : index
      %280 = vector.load %arg22[%c0_193, %c0_194] : memref<16x32xf32, #tpu.memory_space<vmem>>, vector<16x32xf32>
      tpu.vector_store %arg22[%c0_193, %c0_194], %279 {strides = array<i32>} : memref<16x32xf32, #tpu.memory_space<vmem>>, vector<16x32xf32>,
    } else {
    }
    %c0 = arith.constant 0 : index
    %c0_1 = arith.constant 0 : index
    %3 = vector.load %arg22[%c0, %c0_1] : memref<16x32xf32, #tpu.memory_space<vmem>>, vector<16x32xf32>
    %c0_2 = arith.constant 0 : index
    %c0_3 = arith.constant 0 : index
    %c0_4 = arith.constant 0 : index
    %4 = vector.load %arg11[%c0_2, %c0_3, %c0_4] : memref<1x1x32xf32, #tpu.memory_space<vmem>>, vector<1x1x32xf32>
    %5 = vector.shape_cast %4 : vector<1x1x32xf32> to vector<1x32xf32>
    %c0_5 = arith.constant 0 : index
    %c0_6 = arith.constant 0 : index
    %c0_7 = arith.constant 0 : index
    %6 = vector.load %arg12[%c0_5, %c0_6, %c0_7] : memref<1x1x32xf32, #tpu.memory_space<vmem>>, vector<1x1x32xf32>
    %7 = vector.shape_cast %6 : vector<1x1x32xf32> to vector<1x32xf32>
    %cst = arith.constant dense<0.000000e+00> : vector<16xf32>
    %8 = vector.multi_reduction <add>, %3, %cst [1] : vector<16x32xf32> to vector<16xf32>
    %9 = vector.shape_cast %8 : vector<16xf32> to vector<16x1xf32>
    %cst_8 = arith.constant 3.200000e+01 : f32
    %10 = vector.broadcast %cst_8 : f32 to vector<16x1xf32>
    %11 = arith.divf %9, %10 : vector<16x1xf32>
    %12 = vector.broadcast %11 : vector<16x1xf32> to vector<16x32xf32>
    %13 = arith.subf %3, %12 : vector<16x32xf32>
    %14 = arith.mulf %13, %13 : vector<16x32xf32>
    %cst_9 = arith.constant dense<0.000000e+00> : vector<16xf32>
    %15 = vector.multi_reduction <add>, %14, %cst_9 [1] : vector<16x32xf32> to vector<16xf32>
    %16 = vector.shape_cast %15 : vector<16xf32> to vector<16x1xf32>
    %cst_10 = arith.constant 0.0322580636 : f32
    %17 = vector.broadcast %cst_10 : f32 to vector<16x1xf32>
    %18 = arith.mulf %16, %17 : vector<16x1xf32>
    %19 = vector.broadcast %11 : vector<16x1xf32> to vector<16x32xf32>
    %20 = arith.subf %3, %19 : vector<16x32xf32>
    %21 = vector.broadcast %5 : vector<1x32xf32> to vector<16x32xf32>
    %22 = arith.mulf %21, %20 : vector<16x32xf32>
    %23 = math.sqrt %18 : vector<16x1xf32>
    %cst_11 = arith.constant 9.99999997E-7 : f32
    %24 = vector.broadcast %cst_11 : f32 to vector<16x1xf32>
    %25 = arith.addf %23, %24 : vector<16x1xf32>
    %26 = vector.broadcast %25 : vector<16x1xf32> to vector<16x32xf32>
    %27 = arith.divf %22, %26 : vector<16x32xf32>
    %28 = vector.broadcast %7 : vector<1x32xf32> to vector<16x32xf32>
    %29 = arith.addf %27, %28 : vector<16x32xf32>
    %30 = arith.truncf %29 : vector<16x32xf32> to vector<16x32xbf16>
    %cst_12 = arith.constant 0.000000e+00 : f32
    %31 = vector.broadcast %cst_12 : f32 to vector<16x32xf32>
    %c0_13 = arith.constant 0 : index
    %c0_14 = arith.constant 0 : index
    %c0_15 = arith.constant 0 : index
    %c0_16 = arith.constant 0 : index
    %32 = vector.load %arg3[%c0_13, %c0_14, %c0_15, %c0_16] : memref<1x4x32x8xbf16, #tpu.memory_space<vmem>>, vector<1x1x32x8xbf16>
    %33 = vector.shape_cast %32 : vector<1x1x32x8xbf16> to vector<32x8xbf16>
    %cst_17 = arith.constant dense<0.000000e+00> : vector<16x8xf32>
    %34 = tpu.matmul %30, %33, %cst_17 {dimension_numbers = #tpu.dot_dimension_numbers<[1], [0], [0], [1], [0, 0, 1, 1], [], []>} : vector<16x32xbf16>, vector<32x8xbf16>, vector<16x8xf32> -> vector<16x8xf32>
    %c0_18 = arith.constant 0 : index
    %c0_19 = arith.constant 0 : index
    %c0_20 = arith.constant 0 : index
    %c0_21 = arith.constant 0 : index
    %35 = vector.load %arg4[%c0_18, %c0_19, %c0_20, %c0_21] : memref<1x4x1x8xf32, #tpu.memory_space<vmem>>, vector<1x1x1x8xf32>
    %36 = vector.shape_cast %35 : vector<1x1x1x8xf32> to vector<1x8xf32>
    %37 = vector.broadcast %36 : vector<1x8xf32> to vector<16x8xf32>
    %38 = arith.addf %34, %37 : vector<16x8xf32>
    %c0_22 = arith.constant 0 : index
    %c0_23 = arith.constant 0 : index
    %c0_24 = arith.constant 0 : index
    %c0_25 = arith.constant 0 : index
    %39 = vector.load %arg5[%c0_22, %c0_23, %c0_24, %c0_25] : memref<1x4x32x8xbf16, #tpu.memory_space<vmem>>, vector<1x1x32x8xbf16>
    %40 = vector.shape_cast %39 : vector<1x1x32x8xbf16> to vector<32x8xbf16>
    %cst_26 = arith.constant dense<0.000000e+00> : vector<16x8xf32>
    %41 = tpu.matmul %30, %40, %cst_26 {dimension_numbers = #tpu.dot_dimension_numbers<[1], [0], [0], [1], [0, 0, 1, 1], [], []>} : vector<16x32xbf16>, vector<32x8xbf16>, vector<16x8xf32> -> vector<16x8xf32>
    %c0_27 = arith.constant 0 : index
    %c0_28 = arith.constant 0 : index
    %c0_29 = arith.constant 0 : index
    %c0_30 = arith.constant 0 : index
    %42 = vector.load %arg6[%c0_27, %c0_28, %c0_29, %c0_30] : memref<1x4x1x8xf32, #tpu.memory_space<vmem>>, vector<1x1x1x8xf32>
    %43 = vector.shape_cast %42 : vector<1x1x1x8xf32> to vector<1x8xf32>
    %44 = vector.broadcast %43 : vector<1x8xf32> to vector<16x8xf32>
    %45 = arith.addf %41, %44 : vector<16x8xf32>
    %c0_31 = arith.constant 0 : index
    %c0_32 = arith.constant 0 : index
    %c0_33 = arith.constant 0 : index
    %c0_34 = arith.constant 0 : index
    %46 = vector.load %arg7[%c0_31, %c0_32, %c0_33, %c0_34] : memref<1x4x32x8xbf16, #tpu.memory_space<vmem>>, vector<1x1x32x8xbf16>
    %47 = vector.shape_cast %46 : vector<1x1x32x8xbf16> to vector<32x8xbf16>
    %cst_35 = arith.constant dense<0.000000e+00> : vector<16x8xf32>
    %48 = tpu.matmul %30, %47, %cst_35 {dimension_numbers = #tpu.dot_dimension_numbers<[1], [0], [0], [1], [0, 0, 1, 1], [], []>} : vector<16x32xbf16>, vector<32x8xbf16>, vector<16x8xf32> -> vector<16x8xf32>
    %c0_36 = arith.constant 0 : index
    %c0_37 = arith.constant 0 : index
    %c0_38 = arith.constant 0 : index
    %c0_39 = arith.constant 0 : index
    %49 = vector.load %arg8[%c0_36, %c0_37, %c0_38, %c0_39] : memref<1x4x1x8xf32, #tpu.memory_space<vmem>>, vector<1x1x1x8xf32>
    %50 = vector.shape_cast %49 : vector<1x1x1x8xf32> to vector<1x8xf32>
    %51 = vector.broadcast %50 : vector<1x8xf32> to vector<16x8xf32>
    %52 = arith.addf %48, %51 : vector<16x8xf32>
    %cst_40 = arith.constant 0.353553385 : f32
    %53 = vector.broadcast %cst_40 : f32 to vector<16x8xf32>
    %54 = arith.mulf %38, %53 : vector<16x8xf32>
    %55 = arith.truncf %54 : vector<16x8xf32> to vector<16x8xbf16>
    %56 = vector.shape_cast %55 : vector<16x8xbf16> to vector<2x8x8xbf16>
    %57 = arith.truncf %45 : vector<16x8xf32> to vector<16x8xbf16>
    %58 = vector.shape_cast %57 : vector<16x8xbf16> to vector<2x8x8xbf16>
    %59 = arith.truncf %52 : vector<16x8xf32> to vector<16x8xbf16>
    %60 = vector.shape_cast %59 : vector<16x8xbf16> to vector<2x8x8xbf16>
    "tpu.trace_start"() <{level = 10 : i32, message = "bqd,bkd->bqk"}> : () -> ()
    %cst_41 = arith.constant dense<0.000000e+00> : vector<2x8x8xf32>
    %61 = tpu.matmul %56, %58, %cst_41 {dimension_numbers = #tpu.dot_dimension_numbers<[2], [2], [1], [1], [0, 0, 0, 1, 1, 1], [0], [0]>} : vector<2x8x8xbf16>, vector<2x8x8xbf16>, vector<2x8x8xf32> -> vector<2x8x8xf32>
    "tpu.trace_stop"() : () -> ()
    %cst_42 = arith.constant dense<0xFF800000> : vector<2x8xf32>
    %62 = vector.multi_reduction <maximumf>, %61, %cst_42 [2] : vector<2x8x8xf32> to vector<2x8xf32>
    %63 = vector.shape_cast %62 : vector<2x8xf32> to vector<2x8x1xf32>
    %64 = vector.broadcast %63 : vector<2x8x1xf32> to vector<2x8x8xf32>
    %65 = arith.subf %61, %64 : vector<2x8x8xf32>
    %66 = math.exp %65 : vector<2x8x8xf32>
    %cst_43 = arith.constant dense<0.000000e+00> : vector<2x8xf32>
    %67 = vector.multi_reduction <add>, %66, %cst_43 [2] : vector<2x8x8xf32> to vector<2x8xf32>
    %68 = vector.shape_cast %67 : vector<2x8xf32> to vector<2x8x1xf32>
    %69 = tpu.reciprocal %68 {approx = true} : vector<2x8x1xf32> -> vector<2x8x1xf32>
    %70 = vector.broadcast %69 : vector<2x8x1xf32> to vector<2x8x8xf32>
    %71 = arith.mulf %66, %70 : vector<2x8x8xf32>
    %72 = arith.truncf %71 : vector<2x8x8xf32> to vector<2x8x8xbf16>
    "tpu.trace_start"() <{level = 10 : i32, message = "bqk,bkd->bqd"}> : () -> ()
    %cst_44 = arith.constant dense<0.000000e+00> : vector<2x8x8xf32>
    %73 = tpu.matmul %72, %60, %cst_44 {dimension_numbers = #tpu.dot_dimension_numbers<[2], [1], [1], [2], [0, 0, 0, 1, 1, 2], [0], [0]>} : vector<2x8x8xbf16>, vector<2x8x8xbf16>, vector<2x8x8xf32> -> vector<2x8x8xf32>
    "tpu.trace_stop"() : () -> ()
    %74 = vector.shape_cast %73 : vector<2x8x8xf32> to vector<16x8xf32>
    %75 = arith.truncf %74 : vector<16x8xf32> to vector<16x8xbf16>
    %c0_45 = arith.constant 0 : index
    %c0_46 = arith.constant 0 : index
    %c0_47 = arith.constant 0 : index
    %c0_48 = arith.constant 0 : index
    %76 = vector.load %arg9[%c0_45, %c0_46, %c0_47, %c0_48] : memref<1x4x8x32xbf16, #tpu.memory_space<vmem>>, vector<1x1x8x32xbf16>
    %77 = vector.shape_cast %76 : vector<1x1x8x32xbf16> to vector<8x32xbf16>
    %cst_49 = arith.constant dense<0.000000e+00> : vector<16x32xf32>
    %78 = tpu.matmul %75, %77, %cst_49 {dimension_numbers = #tpu.dot_dimension_numbers<[1], [0], [0], [1], [0, 0, 1, 1], [], []>} : vector<16x8xbf16>, vector<8x32xbf16>, vector<16x32xf32> -> vector<16x32xf32>
    %79 = arith.addf %31, %78 : vector<16x32xf32>
    %c0_50 = arith.constant 0 : index
    %c1 = arith.constant 1 : index
    %c0_51 = arith.constant 0 : index
    %c0_52 = arith.constant 0 : index
    %80 = vector.load %arg3[%c0_50, %c1, %c0_51, %c0_52] : memref<1x4x32x8xbf16, #tpu.memory_space<vmem>>, vector<1x1x32x8xbf16>
    %81 = vector.shape_cast %80 : vector<1x1x32x8xbf16> to vector<32x8xbf16>
    %cst_53 = arith.constant dense<0.000000e+00> : vector<16x8xf32>
    %82 = tpu.matmul %30, %81, %cst_53 {dimension_numbers = #tpu.dot_dimension_numbers<[1], [0], [0], [1], [0, 0, 1, 1], [], []>} : vector<16x32xbf16>, vector<32x8xbf16>, vector<16x8xf32> -> vector<16x8xf32>
    %c0_54 = arith.constant 0 : index
    %c1_55 = arith.constant 1 : index
    %c0_56 = arith.constant 0 : index
    %c0_57 = arith.constant 0 : index
    %83 = vector.load %arg4[%c0_54, %c1_55, %c0_56, %c0_57] : memref<1x4x1x8xf32, #tpu.memory_space<vmem>>, vector<1x1x1x8xf32>
    %84 = vector.shape_cast %83 : vector<1x1x1x8xf32> to vector<1x8xf32>
    %85 = vector.broadcast %84 : vector<1x8xf32> to vector<16x8xf32>
    %86 = arith.addf %82, %85 : vector<16x8xf32>
    %c0_58 = arith.constant 0 : index
    %c1_59 = arith.constant 1 : index
    %c0_60 = arith.constant 0 : index
    %c0_61 = arith.constant 0 : index
    %87 = vector.load %arg5[%c0_58, %c1_59, %c0_60, %c0_61] : memref<1x4x32x8xbf16, #tpu.memory_space<vmem>>, vector<1x1x32x8xbf16>
    %88 = vector.shape_cast %87 : vector<1x1x32x8xbf16> to vector<32x8xbf16>
    %cst_62 = arith.constant dense<0.000000e+00> : vector<16x8xf32>
    %89 = tpu.matmul %30, %88, %cst_62 {dimension_numbers = #tpu.dot_dimension_numbers<[1], [0], [0], [1], [0, 0, 1, 1], [], []>} : vector<16x32xbf16>, vector<32x8xbf16>, vector<16x8xf32> -> vector<16x8xf32>
    %c0_63 = arith.constant 0 : index
    %c1_64 = arith.constant 1 : index
    %c0_65 = arith.constant 0 : index
    %c0_66 = arith.constant 0 : index
    %90 = vector.load %arg6[%c0_63, %c1_64, %c0_65, %c0_66] : memref<1x4x1x8xf32, #tpu.memory_space<vmem>>, vector<1x1x1x8xf32>
    %91 = vector.shape_cast %90 : vector<1x1x1x8xf32> to vector<1x8xf32>
    %92 = vector.broadcast %91 : vector<1x8xf32> to vector<16x8xf32>
    %93 = arith.addf %89, %92 : vector<16x8xf32>
    %c0_67 = arith.constant 0 : index
    %c1_68 = arith.constant 1 : index
    %c0_69 = arith.constant 0 : index
    %c0_70 = arith.constant 0 : index
    %94 = vector.load %arg7[%c0_67, %c1_68, %c0_69, %c0_70] : memref<1x4x32x8xbf16, #tpu.memory_space<vmem>>, vector<1x1x32x8xbf16>
    %95 = vector.shape_cast %94 : vector<1x1x32x8xbf16> to vector<32x8xbf16>
    %cst_71 = arith.constant dense<0.000000e+00> : vector<16x8xf32>
    %96 = tpu.matmul %30, %95, %cst_71 {dimension_numbers = #tpu.dot_dimension_numbers<[1], [0], [0], [1], [0, 0, 1, 1], [], []>} : vector<16x32xbf16>, vector<32x8xbf16>, vector<16x8xf32> -> vector<16x8xf32>
    %c0_72 = arith.constant 0 : index
    %c1_73 = arith.constant 1 : index
    %c0_74 = arith.constant 0 : index
    %c0_75 = arith.constant 0 : index
    %97 = vector.load %arg8[%c0_72, %c1_73, %c0_74, %c0_75] : memref<1x4x1x8xf32, #tpu.memory_space<vmem>>, vector<1x1x1x8xf32>
    %98 = vector.shape_cast %97 : vector<1x1x1x8xf32> to vector<1x8xf32>
    %99 = vector.broadcast %98 : vector<1x8xf32> to vector<16x8xf32>
    %100 = arith.addf %96, %99 : vector<16x8xf32>
    %cst_76 = arith.constant 0.353553385 : f32
    %101 = vector.broadcast %cst_76 : f32 to vector<16x8xf32>
    %102 = arith.mulf %86, %101 : vector<16x8xf32>
    %103 = arith.truncf %102 : vector<16x8xf32> to vector<16x8xbf16>
    %104 = vector.shape_cast %103 : vector<16x8xbf16> to vector<2x8x8xbf16>
    %105 = arith.truncf %93 : vector<16x8xf32> to vector<16x8xbf16>
    %106 = vector.shape_cast %105 : vector<16x8xbf16> to vector<2x8x8xbf16>
    %107 = arith.truncf %100 : vector<16x8xf32> to vector<16x8xbf16>
    %108 = vector.shape_cast %107 : vector<16x8xbf16> to vector<2x8x8xbf16>
    "tpu.trace_start"() <{level = 10 : i32, message = "bqd,bkd->bqk"}> : () -> ()
    %cst_77 = arith.constant dense<0.000000e+00> : vector<2x8x8xf32>
    %109 = tpu.matmul %104, %106, %cst_77 {dimension_numbers = #tpu.dot_dimension_numbers<[2], [2], [1], [1], [0, 0, 0, 1, 1, 1], [0], [0]>} : vector<2x8x8xbf16>, vector<2x8x8xbf16>, vector<2x8x8xf32> -> vector<2x8x8xf32>
    "tpu.trace_stop"() : () -> ()
    %cst_78 = arith.constant dense<0xFF800000> : vector<2x8xf32>
    %110 = vector.multi_reduction <maximumf>, %109, %cst_78 [2] : vector<2x8x8xf32> to vector<2x8xf32>
    %111 = vector.shape_cast %110 : vector<2x8xf32> to vector<2x8x1xf32>
    %112 = vector.broadcast %111 : vector<2x8x1xf32> to vector<2x8x8xf32>
    %113 = arith.subf %109, %112 : vector<2x8x8xf32>
    %114 = math.exp %113 : vector<2x8x8xf32>
    %cst_79 = arith.constant dense<0.000000e+00> : vector<2x8xf32>
    %115 = vector.multi_reduction <add>, %114, %cst_79 [2] : vector<2x8x8xf32> to vector<2x8xf32>
    %116 = vector.shape_cast %115 : vector<2x8xf32> to vector<2x8x1xf32>
    %117 = tpu.reciprocal %116 {approx = true} : vector<2x8x1xf32> -> vector<2x8x1xf32>
    %118 = vector.broadcast %117 : vector<2x8x1xf32> to vector<2x8x8xf32>
    %119 = arith.mulf %114, %118 : vector<2x8x8xf32>
    %120 = arith.truncf %119 : vector<2x8x8xf32> to vector<2x8x8xbf16>
    "tpu.trace_start"() <{level = 10 : i32, message = "bqk,bkd->bqd"}> : () -> ()
    %cst_80 = arith.constant dense<0.000000e+00> : vector<2x8x8xf32>
    %121 = tpu.matmul %120, %108, %cst_80 {dimension_numbers = #tpu.dot_dimension_numbers<[2], [1], [1], [2], [0, 0, 0, 1, 1, 2], [0], [0]>} : vector<2x8x8xbf16>, vector<2x8x8xbf16>, vector<2x8x8xf32> -> vector<2x8x8xf32>
    "tpu.trace_stop"() : () -> ()
    %122 = vector.shape_cast %121 : vector<2x8x8xf32> to vector<16x8xf32>
    %123 = arith.truncf %122 : vector<16x8xf32> to vector<16x8xbf16>
    %c0_81 = arith.constant 0 : index
    %c1_82 = arith.constant 1 : index
    %c0_83 = arith.constant 0 : index
    %c0_84 = arith.constant 0 : index
    %124 = vector.load %arg9[%c0_81, %c1_82, %c0_83, %c0_84] : memref<1x4x8x32xbf16, #tpu.memory_space<vmem>>, vector<1x1x8x32xbf16>
    %125 = vector.shape_cast %124 : vector<1x1x8x32xbf16> to vector<8x32xbf16>
    %cst_85 = arith.constant dense<0.000000e+00> : vector<16x32xf32>
    %126 = tpu.matmul %123, %125, %cst_85 {dimension_numbers = #tpu.dot_dimension_numbers<[1], [0], [0], [1], [0, 0, 1, 1], [], []>} : vector<16x8xbf16>, vector<8x32xbf16>, vector<16x32xf32> -> vector<16x32xf32>
    %127 = arith.addf %79, %126 : vector<16x32xf32>
    %c0_86 = arith.constant 0 : index
    %c2 = arith.constant 2 : index
    %c0_87 = arith.constant 0 : index
    %c0_88 = arith.constant 0 : index
    %128 = vector.load %arg3[%c0_86, %c2, %c0_87, %c0_88] : memref<1x4x32x8xbf16, #tpu.memory_space<vmem>>, vector<1x1x32x8xbf16>
    %129 = vector.shape_cast %128 : vector<1x1x32x8xbf16> to vector<32x8xbf16>
    %cst_89 = arith.constant dense<0.000000e+00> : vector<16x8xf32>
    %130 = tpu.matmul %30, %129, %cst_89 {dimension_numbers = #tpu.dot_dimension_numbers<[1], [0], [0], [1], [0, 0, 1, 1], [], []>} : vector<16x32xbf16>, vector<32x8xbf16>, vector<16x8xf32> -> vector<16x8xf32>
    %c0_90 = arith.constant 0 : index
    %c2_91 = arith.constant 2 : index
    %c0_92 = arith.constant 0 : index
    %c0_93 = arith.constant 0 : index
    %131 = vector.load %arg4[%c0_90, %c2_91, %c0_92, %c0_93] : memref<1x4x1x8xf32, #tpu.memory_space<vmem>>, vector<1x1x1x8xf32>
    %132 = vector.shape_cast %131 : vector<1x1x1x8xf32> to vector<1x8xf32>
    %133 = vector.broadcast %132 : vector<1x8xf32> to vector<16x8xf32>
    %134 = arith.addf %130, %133 : vector<16x8xf32>
    %c0_94 = arith.constant 0 : index
    %c2_95 = arith.constant 2 : index
    %c0_96 = arith.constant 0 : index
    %c0_97 = arith.constant 0 : index
    %135 = vector.load %arg5[%c0_94, %c2_95, %c0_96, %c0_97] : memref<1x4x32x8xbf16, #tpu.memory_space<vmem>>, vector<1x1x32x8xbf16>
    %136 = vector.shape_cast %135 : vector<1x1x32x8xbf16> to vector<32x8xbf16>
    %cst_98 = arith.constant dense<0.000000e+00> : vector<16x8xf32>
    %137 = tpu.matmul %30, %136, %cst_98 {dimension_numbers = #tpu.dot_dimension_numbers<[1], [0], [0], [1], [0, 0, 1, 1], [], []>} : vector<16x32xbf16>, vector<32x8xbf16>, vector<16x8xf32> -> vector<16x8xf32>
    %c0_99 = arith.constant 0 : index
    %c2_100 = arith.constant 2 : index
    %c0_101 = arith.constant 0 : index
    %c0_102 = arith.constant 0 : index
    %138 = vector.load %arg6[%c0_99, %c2_100, %c0_101, %c0_102] : memref<1x4x1x8xf32, #tpu.memory_space<vmem>>, vector<1x1x1x8xf32>
    %139 = vector.shape_cast %138 : vector<1x1x1x8xf32> to vector<1x8xf32>
    %140 = vector.broadcast %139 : vector<1x8xf32> to vector<16x8xf32>
    %141 = arith.addf %137, %140 : vector<16x8xf32>
    %c0_103 = arith.constant 0 : index
    %c2_104 = arith.constant 2 : index
    %c0_105 = arith.constant 0 : index
    %c0_106 = arith.constant 0 : index
    %142 = vector.load %arg7[%c0_103, %c2_104, %c0_105, %c0_106] : memref<1x4x32x8xbf16, #tpu.memory_space<vmem>>, vector<1x1x32x8xbf16>
    %143 = vector.shape_cast %142 : vector<1x1x32x8xbf16> to vector<32x8xbf16>
    %cst_107 = arith.constant dense<0.000000e+00> : vector<16x8xf32>
    %144 = tpu.matmul %30, %143, %cst_107 {dimension_numbers = #tpu.dot_dimension_numbers<[1], [0], [0], [1], [0, 0, 1, 1], [], []>} : vector<16x32xbf16>, vector<32x8xbf16>, vector<16x8xf32> -> vector<16x8xf32>
    %c0_108 = arith.constant 0 : index
    %c2_109 = arith.constant 2 : index
    %c0_110 = arith.constant 0 : index
    %c0_111 = arith.constant 0 : index
    %145 = vector.load %arg8[%c0_108, %c2_109, %c0_110, %c0_111] : memref<1x4x1x8xf32, #tpu.memory_space<vmem>>, vector<1x1x1x8xf32>
    %146 = vector.shape_cast %145 : vector<1x1x1x8xf32> to vector<1x8xf32>
    %147 = vector.broadcast %146 : vector<1x8xf32> to vector<16x8xf32>
    %148 = arith.addf %144, %147 : vector<16x8xf32>
    %cst_112 = arith.constant 0.353553385 : f32
    %149 = vector.broadcast %cst_112 : f32 to vector<16x8xf32>
    %150 = arith.mulf %134, %149 : vector<16x8xf32>
    %151 = arith.truncf %150 : vector<16x8xf32> to vector<16x8xbf16>
    %152 = vector.shape_cast %151 : vector<16x8xbf16> to vector<2x8x8xbf16>
    %153 = arith.truncf %141 : vector<16x8xf32> to vector<16x8xbf16>
    %154 = vector.shape_cast %153 : vector<16x8xbf16> to vector<2x8x8xbf16>
    %155 = arith.truncf %148 : vector<16x8xf32> to vector<16x8xbf16>
    %156 = vector.shape_cast %155 : vector<16x8xbf16> to vector<2x8x8xbf16>
    "tpu.trace_start"() <{level = 10 : i32, message = "bqd,bkd->bqk"}> : () -> ()
    %cst_113 = arith.constant dense<0.000000e+00> : vector<2x8x8xf32>
    %157 = tpu.matmul %152, %154, %cst_113 {dimension_numbers = #tpu.dot_dimension_numbers<[2], [2], [1], [1], [0, 0, 0, 1, 1, 1], [0], [0]>} : vector<2x8x8xbf16>, vector<2x8x8xbf16>, vector<2x8x8xf32> -> vector<2x8x8xf32>
    "tpu.trace_stop"() : () -> ()
    %cst_114 = arith.constant dense<0xFF800000> : vector<2x8xf32>
    %158 = vector.multi_reduction <maximumf>, %157, %cst_114 [2] : vector<2x8x8xf32> to vector<2x8xf32>
    %159 = vector.shape_cast %158 : vector<2x8xf32> to vector<2x8x1xf32>
    %160 = vector.broadcast %159 : vector<2x8x1xf32> to vector<2x8x8xf32>
    %161 = arith.subf %157, %160 : vector<2x8x8xf32>
    %162 = math.exp %161 : vector<2x8x8xf32>
    %cst_115 = arith.constant dense<0.000000e+00> : vector<2x8xf32>
    %163 = vector.multi_reduction <add>, %162, %cst_115 [2] : vector<2x8x8xf32> to vector<2x8xf32>
    %164 = vector.shape_cast %163 : vector<2x8xf32> to vector<2x8x1xf32>
    %165 = tpu.reciprocal %164 {approx = true} : vector<2x8x1xf32> -> vector<2x8x1xf32>
    %166 = vector.broadcast %165 : vector<2x8x1xf32> to vector<2x8x8xf32>
    %167 = arith.mulf %162, %166 : vector<2x8x8xf32>
    %168 = arith.truncf %167 : vector<2x8x8xf32> to vector<2x8x8xbf16>
    "tpu.trace_start"() <{level = 10 : i32, message = "bqk,bkd->bqd"}> : () -> ()
    %cst_116 = arith.constant dense<0.000000e+00> : vector<2x8x8xf32>
    %169 = tpu.matmul %168, %156, %cst_116 {dimension_numbers = #tpu.dot_dimension_numbers<[2], [1], [1], [2], [0, 0, 0, 1, 1, 2], [0], [0]>} : vector<2x8x8xbf16>, vector<2x8x8xbf16>, vector<2x8x8xf32> -> vector<2x8x8xf32>
    "tpu.trace_stop"() : () -> ()
    %170 = vector.shape_cast %169 : vector<2x8x8xf32> to vector<16x8xf32>
    %171 = arith.truncf %170 : vector<16x8xf32> to vector<16x8xbf16>
    %c0_117 = arith.constant 0 : index
    %c2_118 = arith.constant 2 : index
    %c0_119 = arith.constant 0 : index
    %c0_120 = arith.constant 0 : index
    %172 = vector.load %arg9[%c0_117, %c2_118, %c0_119, %c0_120] : memref<1x4x8x32xbf16, #tpu.memory_space<vmem>>, vector<1x1x8x32xbf16>
    %173 = vector.shape_cast %172 : vector<1x1x8x32xbf16> to vector<8x32xbf16>
    %cst_121 = arith.constant dense<0.000000e+00> : vector<16x32xf32>
    %174 = tpu.matmul %171, %173, %cst_121 {dimension_numbers = #tpu.dot_dimension_numbers<[1], [0], [0], [1], [0, 0, 1, 1], [], []>} : vector<16x8xbf16>, vector<8x32xbf16>, vector<16x32xf32> -> vector<16x32xf32>
    %175 = arith.addf %127, %174 : vector<16x32xf32>
    %c0_122 = arith.constant 0 : index
    %c3 = arith.constant 3 : index
    %c0_123 = arith.constant 0 : index
    %c0_124 = arith.constant 0 : index
    %176 = vector.load %arg3[%c0_122, %c3, %c0_123, %c0_124] : memref<1x4x32x8xbf16, #tpu.memory_space<vmem>>, vector<1x1x32x8xbf16>
    %177 = vector.shape_cast %176 : vector<1x1x32x8xbf16> to vector<32x8xbf16>
    %cst_125 = arith.constant dense<0.000000e+00> : vector<16x8xf32>
    %178 = tpu.matmul %30, %177, %cst_125 {dimension_numbers = #tpu.dot_dimension_numbers<[1], [0], [0], [1], [0, 0, 1, 1], [], []>} : vector<16x32xbf16>, vector<32x8xbf16>, vector<16x8xf32> -> vector<16x8xf32>
    %c0_126 = arith.constant 0 : index
    %c3_127 = arith.constant 3 : index
    %c0_128 = arith.constant 0 : index
    %c0_129 = arith.constant 0 : index
    %179 = vector.load %arg4[%c0_126, %c3_127, %c0_128, %c0_129] : memref<1x4x1x8xf32, #tpu.memory_space<vmem>>, vector<1x1x1x8xf32>
    %180 = vector.shape_cast %179 : vector<1x1x1x8xf32> to vector<1x8xf32>
    %181 = vector.broadcast %180 : vector<1x8xf32> to vector<16x8xf32>
    %182 = arith.addf %178, %181 : vector<16x8xf32>
    %c0_130 = arith.constant 0 : index
    %c3_131 = arith.constant 3 : index
    %c0_132 = arith.constant 0 : index
    %c0_133 = arith.constant 0 : index
    %183 = vector.load %arg5[%c0_130, %c3_131, %c0_132, %c0_133] : memref<1x4x32x8xbf16, #tpu.memory_space<vmem>>, vector<1x1x32x8xbf16>
    %184 = vector.shape_cast %183 : vector<1x1x32x8xbf16> to vector<32x8xbf16>
    %cst_134 = arith.constant dense<0.000000e+00> : vector<16x8xf32>
    %185 = tpu.matmul %30, %184, %cst_134 {dimension_numbers = #tpu.dot_dimension_numbers<[1], [0], [0], [1], [0, 0, 1, 1], [], []>} : vector<16x32xbf16>, vector<32x8xbf16>, vector<16x8xf32> -> vector<16x8xf32>
    %c0_135 = arith.constant 0 : index
    %c3_136 = arith.constant 3 : index
    %c0_137 = arith.constant 0 : index
    %c0_138 = arith.constant 0 : index
    %186 = vector.load %arg6[%c0_135, %c3_136, %c0_137, %c0_138] : memref<1x4x1x8xf32, #tpu.memory_space<vmem>>, vector<1x1x1x8xf32>
    %187 = vector.shape_cast %186 : vector<1x1x1x8xf32> to vector<1x8xf32>
    %188 = vector.broadcast %187 : vector<1x8xf32> to vector<16x8xf32>
    %189 = arith.addf %185, %188 : vector<16x8xf32>
    %c0_139 = arith.constant 0 : index
    %c3_140 = arith.constant 3 : index
    %c0_141 = arith.constant 0 : index
    %c0_142 = arith.constant 0 : index
    %190 = vector.load %arg7[%c0_139, %c3_140, %c0_141, %c0_142] : memref<1x4x32x8xbf16, #tpu.memory_space<vmem>>, vector<1x1x32x8xbf16>
    %191 = vector.shape_cast %190 : vector<1x1x32x8xbf16> to vector<32x8xbf16>
    %cst_143 = arith.constant dense<0.000000e+00> : vector<16x8xf32>
    %192 = tpu.matmul %30, %191, %cst_143 {dimension_numbers = #tpu.dot_dimension_numbers<[1], [0], [0], [1], [0, 0, 1, 1], [], []>} : vector<16x32xbf16>, vector<32x8xbf16>, vector<16x8xf32> -> vector<16x8xf32>
    %c0_144 = arith.constant 0 : index
    %c3_145 = arith.constant 3 : index
    %c0_146 = arith.constant 0 : index
    %c0_147 = arith.constant 0 : index
    %193 = vector.load %arg8[%c0_144, %c3_145, %c0_146, %c0_147] : memref<1x4x1x8xf32, #tpu.memory_space<vmem>>, vector<1x1x1x8xf32>
    %194 = vector.shape_cast %193 : vector<1x1x1x8xf32> to vector<1x8xf32>
    %195 = vector.broadcast %194 : vector<1x8xf32> to vector<16x8xf32>
    %196 = arith.addf %192, %195 : vector<16x8xf32>
    %cst_148 = arith.constant 0.353553385 : f32
    %197 = vector.broadcast %cst_148 : f32 to vector<16x8xf32>
    %198 = arith.mulf %182, %197 : vector<16x8xf32>
    %199 = arith.truncf %198 : vector<16x8xf32> to vector<16x8xbf16>
    %200 = vector.shape_cast %199 : vector<16x8xbf16> to vector<2x8x8xbf16>
    %201 = arith.truncf %189 : vector<16x8xf32> to vector<16x8xbf16>
    %202 = vector.shape_cast %201 : vector<16x8xbf16> to vector<2x8x8xbf16>
    %203 = arith.truncf %196 : vector<16x8xf32> to vector<16x8xbf16>
    %204 = vector.shape_cast %203 : vector<16x8xbf16> to vector<2x8x8xbf16>
    "tpu.trace_start"() <{level = 10 : i32, message = "bqd,bkd->bqk"}> : () -> ()
    %cst_149 = arith.constant dense<0.000000e+00> : vector<2x8x8xf32>
    %205 = tpu.matmul %200, %202, %cst_149 {dimension_numbers = #tpu.dot_dimension_numbers<[2], [2], [1], [1], [0, 0, 0, 1, 1, 1], [0], [0]>} : vector<2x8x8xbf16>, vector<2x8x8xbf16>, vector<2x8x8xf32> -> vector<2x8x8xf32>
    "tpu.trace_stop"() : () -> ()
    %cst_150 = arith.constant dense<0xFF800000> : vector<2x8xf32>
    %206 = vector.multi_reduction <maximumf>, %205, %cst_150 [2] : vector<2x8x8xf32> to vector<2x8xf32>
    %207 = vector.shape_cast %206 : vector<2x8xf32> to vector<2x8x1xf32>
    %208 = vector.broadcast %207 : vector<2x8x1xf32> to vector<2x8x8xf32>
    %209 = arith.subf %205, %208 : vector<2x8x8xf32>
    %210 = math.exp %209 : vector<2x8x8xf32>
    %cst_151 = arith.constant dense<0.000000e+00> : vector<2x8xf32>
    %211 = vector.multi_reduction <add>, %210, %cst_151 [2] : vector<2x8x8xf32> to vector<2x8xf32>
    %212 = vector.shape_cast %211 : vector<2x8xf32> to vector<2x8x1xf32>
    %213 = tpu.reciprocal %212 {approx = true} : vector<2x8x1xf32> -> vector<2x8x1xf32>
    %214 = vector.broadcast %213 : vector<2x8x1xf32> to vector<2x8x8xf32>
    %215 = arith.mulf %210, %214 : vector<2x8x8xf32>
    %216 = arith.truncf %215 : vector<2x8x8xf32> to vector<2x8x8xbf16>
    "tpu.trace_start"() <{level = 10 : i32, message = "bqk,bkd->bqd"}> : () -> ()
    %cst_152 = arith.constant dense<0.000000e+00> : vector<2x8x8xf32>
    %217 = tpu.matmul %216, %204, %cst_152 {dimension_numbers = #tpu.dot_dimension_numbers<[2], [1], [1], [2], [0, 0, 0, 1, 1, 2], [0], [0]>} : vector<2x8x8xbf16>, vector<2x8x8xbf16>, vector<2x8x8xf32> -> vector<2x8x8xf32>
    "tpu.trace_stop"() : () -> ()
    %218 = vector.shape_cast %217 : vector<2x8x8xf32> to vector<16x8xf32>
    %219 = arith.truncf %218 : vector<16x8xf32> to vector<16x8xbf16>
    %c0_153 = arith.constant 0 : index
    %c3_154 = arith.constant 3 : index
    %c0_155 = arith.constant 0 : index
    %c0_156 = arith.constant 0 : index
    %220 = vector.load %arg9[%c0_153, %c3_154, %c0_155, %c0_156] : memref<1x4x8x32xbf16, #tpu.memory_space<vmem>>, vector<1x1x8x32xbf16>
    %221 = vector.shape_cast %220 : vector<1x1x8x32xbf16> to vector<8x32xbf16>
    %cst_157 = arith.constant dense<0.000000e+00> : vector<16x32xf32>
    %222 = tpu.matmul %219, %221, %cst_157 {dimension_numbers = #tpu.dot_dimension_numbers<[1], [0], [0], [1], [0, 0, 1, 1], [], []>} : vector<16x8xbf16>, vector<8x32xbf16>, vector<16x32xf32> -> vector<16x32xf32>
    %223 = arith.addf %175, %222 : vector<16x32xf32>
    %224 = arith.addf %3, %223 : vector<16x32xf32>
    %c0_158 = arith.constant 0 : index
    %c0_159 = arith.constant 0 : index
    %c0_160 = arith.constant 0 : index
    %225 = vector.load %arg10[%c0_158, %c0_159, %c0_160] : memref<1x1x32xf32, #tpu.memory_space<vmem>>, vector<1x1x32xf32>
    %226 = vector.shape_cast %225 : vector<1x1x32xf32> to vector<1x32xf32>
    %227 = vector.broadcast %226 : vector<1x32xf32> to vector<16x32xf32>
    %228 = arith.addf %224, %227 : vector<16x32xf32>
    %c0_161 = arith.constant 0 : index
    %c0_162 = arith.constant 0 : index
    %c0_163 = arith.constant 0 : index
    %229 = vector.load %arg17[%c0_161, %c0_162, %c0_163] : memref<1x1x32xf32, #tpu.memory_space<vmem>>, vector<1x1x32xf32>
    %230 = vector.shape_cast %229 : vector<1x1x32xf32> to vector<1x32xf32>
    %c0_164 = arith.constant 0 : index
    %c0_165 = arith.constant 0 : index
    %c0_166 = arith.constant 0 : index
    %231 = vector.load %arg18[%c0_164, %c0_165, %c0_166] : memref<1x1x32xf32, #tpu.memory_space<vmem>>, vector<1x1x32xf32>
    %232 = vector.shape_cast %231 : vector<1x1x32xf32> to vector<1x32xf32>
    %cst_167 = arith.constant dense<0.000000e+00> : vector<16xf32>
    %233 = vector.multi_reduction <add>, %228, %cst_167 [1] : vector<16x32xf32> to vector<16xf32>
    %234 = vector.shape_cast %233 : vector<16xf32> to vector<16x1xf32>
    %cst_168 = arith.constant 3.200000e+01 : f32
    %235 = vector.broadcast %cst_168 : f32 to vector<16x1xf32>
    %236 = arith.divf %234, %235 : vector<16x1xf32>
    %237 = vector.broadcast %236 : vector<16x1xf32> to vector<16x32xf32>
    %238 = arith.subf %228, %237 : vector<16x32xf32>
    %239 = arith.mulf %238, %238 : vector<16x32xf32>
    %cst_169 = arith.constant dense<0.000000e+00> : vector<16xf32>
    %240 = vector.multi_reduction <add>, %239, %cst_169 [1] : vector<16x32xf32> to vector<16xf32>
    %241 = vector.shape_cast %240 : vector<16xf32> to vector<16x1xf32>
    %cst_170 = arith.constant 0.0322580636 : f32
    %242 = vector.broadcast %cst_170 : f32 to vector<16x1xf32>
    %243 = arith.mulf %241, %242 : vector<16x1xf32>
    %244 = vector.broadcast %236 : vector<16x1xf32> to vector<16x32xf32>
    %245 = arith.subf %228, %244 : vector<16x32xf32>
    %246 = vector.broadcast %230 : vector<1x32xf32> to vector<16x32xf32>
    %247 = arith.mulf %246, %245 : vector<16x32xf32>
    %248 = math.sqrt %243 : vector<16x1xf32>
    %cst_171 = arith.constant 9.99999997E-7 : f32
    %249 = vector.broadcast %cst_171 : f32 to vector<16x1xf32>
    %250 = arith.addf %248, %249 : vector<16x1xf32>
    %251 = vector.broadcast %250 : vector<16x1xf32> to vector<16x32xf32>
    %252 = arith.divf %247, %251 : vector<16x32xf32>
    %253 = vector.broadcast %232 : vector<1x32xf32> to vector<16x32xf32>
    %254 = arith.addf %252, %253 : vector<16x32xf32>
    %255 = arith.truncf %254 : vector<16x32xf32> to vector<16x32xbf16>
    %c0_172 = arith.constant 0 : index
    %c0_173 = arith.constant 0 : index
    %c0_174 = arith.constant 0 : index
    %256 = vector.load %arg13[%c0_172, %c0_173, %c0_174] : memref<1x32x64xbf16, #tpu.memory_space<vmem>>, vector<1x32x64xbf16>
    %257 = vector.shape_cast %256 : vector<1x32x64xbf16> to vector<32x64xbf16>
    %cst_175 = arith.constant dense<0.000000e+00> : vector<16x64xf32>
    %258 = tpu.matmul %255, %257, %cst_175 {dimension_numbers = #tpu.dot_dimension_numbers<[1], [0], [0], [1], [0, 0, 1, 1], [], []>} : vector<16x32xbf16>, vector<32x64xbf16>, vector<16x64xf32> -> vector<16x64xf32>
    %c0_176 = arith.constant 0 : index
    %c0_177 = arith.constant 0 : index
    %c0_178 = arith.constant 0 : index
    %259 = vector.load %arg14[%c0_176, %c0_177, %c0_178] : memref<1x1x64xf32, #tpu.memory_space<vmem>>, vector<1x1x64xf32>
    %260 = vector.shape_cast %259 : vector<1x1x64xf32> to vector<1x64xf32>
    %261 = vector.broadcast %260 : vector<1x64xf32> to vector<16x64xf32>
    %262 = arith.addf %258, %261 : vector<16x64xf32>
    %cst_179 = arith.constant 0.000000e+00 : f32
    %263 = vector.broadcast %cst_179 : f32 to vector<16x64xf32>
    %264 = arith.maximumf %262, %263 : vector<16x64xf32>
    %265 = arith.truncf %264 : vector<16x64xf32> to vector<16x64xbf16>
    %c0_180 = arith.constant 0 : index
    %c0_181 = arith.constant 0 : index
    %c0_182 = arith.constant 0 : index
    %266 = vector.load %arg15[%c0_180, %c0_181, %c0_182] : memref<1x64x32xbf16, #tpu.memory_space<vmem>>, vector<1x64x32xbf16>
    %267 = vector.shape_cast %266 : vector<1x64x32xbf16> to vector<64x32xbf16>
    %cst_183 = arith.constant dense<0.000000e+00> : vector<16x32xf32>
    %268 = tpu.matmul %265, %267, %cst_183 {dimension_numbers = #tpu.dot_dimension_numbers<[1], [0], [0], [1], [0, 0, 1, 1], [], []>} : vector<16x64xbf16>, vector<64x32xbf16>, vector<16x32xf32> -> vector<16x32xf32>
    %c0_184 = arith.constant 0 : index
    %c0_185 = arith.constant 0 : index
    %c0_186 = arith.constant 0 : index
    %269 = vector.load %arg16[%c0_184, %c0_185, %c0_186] : memref<1x1x32xf32, #tpu.memory_space<vmem>>, vector<1x1x32xf32>
    %270 = vector.shape_cast %269 : vector<1x1x32xf32> to vector<1x32xf32>
    %271 = vector.broadcast %270 : vector<1x32xf32> to vector<16x32xf32>
    %272 = arith.addf %268, %271 : vector<16x32xf32>
    %273 = arith.addf %228, %272 : vector<16x32xf32>
    %c0_187 = arith.constant 0 : index
    %c0_188 = arith.constant 0 : index
    %274 = vector.load %arg22[%c0_187, %c0_188] : memref<16x32xf32, #tpu.memory_space<vmem>>, vector<16x32xf32>
    tpu.vector_store %arg22[%c0_187, %c0_188], %273 {strides = array<i32>} : memref<16x32xf32, #tpu.memory_space<vmem>>, vector<16x32xf32>,
    %c1_i32 = arith.constant 1 : i32
    %275 = arith.cmpi eq, %arg1, %c1_i32 : i32
    %276 = arith.extui %275 : i1 to i32
    %c0_i32_189 = arith.constant 0 : i32
    %277 = arith.cmpi ne, %276, %c0_i32_189 : i32
    scf.if %277 {
      %c0_190 = arith.constant 0 : index
      %c0_191 = arith.constant 0 : index
      %278 = vector.load %arg19[%c0_190, %c0_191] : memref<1x32xf32, #tpu.memory_space<vmem>>, vector<1x32xf32>
      %c0_192 = arith.constant 0 : index
      %c0_193 = arith.constant 0 : index
      %279 = vector.load %arg20[%c0_192, %c0_193] : memref<1x32xf32, #tpu.memory_space<vmem>>, vector<1x32xf32>
      %cst_194 = arith.constant dense<0.000000e+00> : vector<16xf32>
      %280 = vector.multi_reduction <add>, %273, %cst_194 [1] : vector<16x32xf32> to vector<16xf32>
      %281 = vector.shape_cast %280 : vector<16xf32> to vector<16x1xf32>
      %cst_195 = arith.constant 3.200000e+01 : f32
      %282 = vector.broadcast %cst_195 : f32 to vector<16x1xf32>
      %283 = arith.divf %281, %282 : vector<16x1xf32>
      %284 = vector.broadcast %283 : vector<16x1xf32> to vector<16x32xf32>
      %285 = arith.subf %273, %284 : vector<16x32xf32>
      %286 = arith.mulf %285, %285 : vector<16x32xf32>
      %cst_196 = arith.constant dense<0.000000e+00> : vector<16xf32>
      %287 = vector.multi_reduction <add>, %286, %cst_196 [1] : vector<16x32xf32> to vector<16xf32>
      %288 = vector.shape_cast %287 : vector<16xf32> to vector<16x1xf32>
      %cst_197 = arith.constant 0.0322580636 : f32
      %289 = vector.broadcast %cst_197 : f32 to vector<16x1xf32>
      %290 = arith.mulf %288, %289 : vector<16x1xf32>
      %291 = vector.broadcast %283 : vector<16x1xf32> to vector<16x32xf32>
      %292 = arith.subf %273, %291 : vector<16x32xf32>
      %293 = vector.broadcast %278 : vector<1x32xf32> to vector<16x32xf32>
      %294 = arith.mulf %293, %292 : vector<16x32xf32>
      %295 = math.sqrt %290 : vector<16x1xf32>
      %cst_198 = arith.constant 9.99999997E-7 : f32
      %296 = vector.broadcast %cst_198 : f32 to vector<16x1xf32>
      %297 = arith.addf %295, %296 : vector<16x1xf32>
      %298 = vector.broadcast %297 : vector<16x1xf32> to vector<16x32xf32>
      %299 = arith.divf %294, %298 : vector<16x32xf32>
      %300 = vector.broadcast %279 : vector<1x32xf32> to vector<16x32xf32>
      %301 = arith.addf %299, %300 : vector<16x32xf32>
      %302 = vector.shape_cast %301 : vector<16x32xf32> to vector<2x8x32xf32>
      %c0_199 = arith.constant 0 : index
      %c0_200 = arith.constant 0 : index
      %c0_201 = arith.constant 0 : index
      %303 = vector.load %arg21[%c0_199, %c0_200, %c0_201] : memref<2x8x32xf32, #tpu.memory_space<vmem>>, vector<2x8x32xf32>
      tpu.vector_store %arg21[%c0_199, %c0_200, %c0_201], %302 {strides = array<i32>} : memref<2x8x32xf32, #tpu.memory_space<vmem>>, vector<2x8x32xf32>,
    } else {
    }
    return
  }
  func.func @transform_0(%arg0: i32, %arg1: i32) -> (i32, i32, i32) {
    %c0_i32 = arith.constant 0 : i32
    %c0_i32_0 = arith.constant 0 : i32
    %c0_i32_1 = arith.constant 0 : i32
    return %arg0, %c0_i32, %c0_i32_0 : i32, i32, i32
  }
  func.func @transform_1(%arg0: i32, %arg1: i32) -> (i32, i32, i32, i32) {
    %c0_i32 = arith.constant 0 : i32
    %c0_i32_0 = arith.constant 0 : i32
    %c0_i32_1 = arith.constant 0 : i32
    %c0_i32_2 = arith.constant 0 : i32
    return %arg1, %c0_i32, %c0_i32_0, %c0_i32_1 : i32, i32, i32, i32
  }
  func.func @transform_2(%arg0: i32, %arg1: i32) -> (i32, i32, i32, i32) {
    %c0_i32 = arith.constant 0 : i32
    %c0_i32_0 = arith.constant 0 : i32
    %c0_i32_1 = arith.constant 0 : i32
    %c0_i32_2 = arith.constant 0 : i32
    return %arg1, %c0_i32, %c0_i32_0, %c0_i32_1 : i32, i32, i32, i32
  }
  func.func @transform_3(%arg0: i32, %arg1: i32) -> (i32, i32, i32, i32) {
    %c0_i32 = arith.constant 0 : i32
    %c0_i32_0 = arith.constant 0 : i32
    %c0_i32_1 = arith.constant 0 : i32
    %c0_i32_2 = arith.constant 0 : i32
    return %arg1, %c0_i32, %c0_i32_0, %c0_i32_1 : i32, i32, i32, i32
  }
  func.func @transform_4(%arg0: i32, %arg1: i32) -> (i32, i32, i32, i32) {
    %c0_i32 = arith.constant 0 : i32
    %c0_i32_0 = arith.constant 0 : i32
    %c0_i32_1 = arith.constant 0 : i32
    %c0_i32_2 = arith.constant 0 : i32
    return %arg1, %c0_i32, %c0_i32_0, %c0_i32_1 : i32, i32, i32, i32
  }
  func.func @transform_5(%arg0: i32, %arg1: i32) -> (i32, i32, i32, i32) {
    %c0_i32 = arith.constant 0 : i32
    %c0_i32_0 = arith.constant 0 : i32
    %c0_i32_1 = arith.constant 0 : i32
    %c0_i32_2 = arith.constant 0 : i32
    return %arg1, %c0_i32, %c0_i32_0, %c0_i32_1 : i32, i32, i32, i32
  }
  func.func @transform_6(%arg0: i32, %arg1: i32) -> (i32, i32, i32, i32) {
    %c0_i32 = arith.constant 0 : i32
    %c0_i32_0 = arith.constant 0 : i32
    %c0_i32_1 = arith.constant 0 : i32
    %c0_i32_2 = arith.constant 0 : i32
    return %arg1, %c0_i32, %c0_i32_0, %c0_i32_1 : i32, i32, i32, i32
  }
  func.func @transform_7(%arg0: i32, %arg1: i32) -> (i32, i32, i32, i32) {
    %c0_i32 = arith.constant 0 : i32
    %c0_i32_0 = arith.constant 0 : i32
    %c0_i32_1 = arith.constant 0 : i32
    %c0_i32_2 = arith.constant 0 : i32
    return %arg1, %c0_i32, %c0_i32_0, %c0_i32_1 : i32, i32, i32, i32
  }
  func.func @transform_8(%arg0: i32, %arg1: i32) -> (i32, i32, i32) {
    %c0_i32 = arith.constant 0 : i32
    %c0_i32_0 = arith.constant 0 : i32
    %c0_i32_1 = arith.constant 0 : i32
    return %arg1, %c0_i32, %c0_i32_0 : i32, i32, i32
  }
  func.func @transform_9(%arg0: i32, %arg1: i32) -> (i32, i32, i32) {
    %c0_i32 = arith.constant 0 : i32
    %c0_i32_0 = arith.constant 0 : i32
    %c0_i32_1 = arith.constant 0 : i32
    return %arg1, %c0_i32, %c0_i32_0 : i32, i32, i32
  }
  func.func @transform_10(%arg0: i32, %arg1: i32) -> (i32, i32, i32) {
    %c0_i32 = arith.constant 0 : i32
    %c0_i32_0 = arith.constant 0 : i32
    %c0_i32_1 = arith.constant 0 : i32
    return %arg1, %c0_i32, %c0_i32_0 : i32, i32, i32
  }
  func.func @transform_11(%arg0: i32, %arg1: i32) -> (i32, i32, i32) {
    %c0_i32 = arith.constant 0 : i32
    %c0_i32_0 = arith.constant 0 : i32
    %c0_i32_1 = arith.constant 0 : i32
    return %arg1, %c0_i32, %c0_i32_0 : i32, i32, i32
  }
  func.func @transform_12(%arg0: i32, %arg1: i32) -> (i32, i32, i32) {
    %c0_i32 = arith.constant 0 : i32
    %c0_i32_0 = arith.constant 0 : i32
    %c0_i32_1 = arith.constant 0 : i32
    return %arg1, %c0_i32, %c0_i32_0 : i32, i32, i32
  }
  func.func @transform_13(%arg0: i32, %arg1: i32) -> (i32, i32, i32) {
    %c0_i32 = arith.constant 0 : i32
    %c0_i32_0 = arith.constant 0 : i32
    %c0_i32_1 = arith.constant 0 : i32
    return %arg1, %c0_i32, %c0_i32_0 : i32, i32, i32
  }
  func.func @transform_14(%arg0: i32, %arg1: i32) -> (i32, i32, i32) {
    %c0_i32 = arith.constant 0 : i32
    %c0_i32_0 = arith.constant 0 : i32
    %c0_i32_1 = arith.constant 0 : i32
    return %arg1, %c0_i32, %c0_i32_0 : i32, i32, i32
  }
  func.func @transform_15(%arg0: i32, %arg1: i32) -> (i32, i32, i32) {
    %c0_i32 = arith.constant 0 : i32
    %c0_i32_0 = arith.constant 0 : i32
    %c0_i32_1 = arith.constant 0 : i32
    return %arg1, %c0_i32, %c0_i32_0 : i32, i32, i32
  }
  func.func @transform_16(%arg0: i32, %arg1: i32) -> (i32, i32, i32) {
    %c0_i32 = arith.constant 0 : i32
    %c0_i32_0 = arith.constant 0 : i32
    %c0_i32_1 = arith.constant 0 : i32
    return %arg1, %c0_i32, %c0_i32_0 : i32, i32, i32
  }
  func.func @transform_17(%arg0: i32, %arg1: i32) -> (i32, i32) {
    %c0_i32 = arith.constant 0 : i32
    %c0_i32_0 = arith.constant 0 : i32
    %c0_i32_1 = arith.constant 0 : i32
    return %c0_i32, %c0_i32_0 : i32, i32
  }
  func.func @transform_18(%arg0: i32, %arg1: i32) -> (i32, i32) {
    %c0_i32 = arith.constant 0 : i32
    %c0_i32_0 = arith.constant 0 : i32
    %c0_i32_1 = arith.constant 0 : i32
    return %c0_i32, %c0_i32_0 : i32, i32
  }
  func.func @transform_19(%arg0: i32, %arg1: i32) -> (i32, i32, i32) {
    %c0_i32 = arith.constant 0 : i32
    %c0_i32_0 = arith.constant 0 : i32
    %c0_i32_1 = arith.constant 0 : i32
    return %arg0, %c0_i32, %c0_i32_0 : i32, i32, i32
  }
}

</mosaic_0001>

<bundles_post_ra>
// kernel: tpu_custom_call.1
= control target key start
LH: loop header
LB: loop body
LE: loop exit
PB: predicated region body
PF: predicated region fallthrough
CT: control target
= control target key end

     0   :  { %s4682_s0 = inlined_call_operand.vmem [shape: f32[2,8,32], index: 0, kind: input, shape index: {}]   ;;  %s4683_s1 = inlined_call_operand.vmem [shape: bf16[2,4,32,8], index: 1, kind: input, shape index: {}]   ;;  %s4684_s2 = inlined_call_operand.vmem [shape: f32[2,4,1,8], index: 2, kind: input, shape index: {}]   ;;  %s4685_s3 = inlined_call_operand.vmem [shape: bf16[2,4,32,8], index: 3, kind: input, shape index: {}]   ;;  %s4686_s4 = inlined_call_operand.vmem [shape: f32[2,4,1,8], index: 4, kind: input, shape index: {}]   ;;  %s4687_s5 = inlined_call_operand.vmem [shape: bf16[2,4,32,8], index: 5, kind: input, shape index: {}]   ;;  %s4688_s6 = inlined_call_operand.vmem [shape: f32[2,4,1,8], index: 6, kind: input, shape index: {}]   ;;  %s4689_s7 = inlined_call_operand.vmem [shape: bf16[2,4,8,32], index: 7, kind: input, shape index: {}]   ;;  %s4690_s8 = inlined_call_operand.vmem [shape: f32[2,1,32], index: 8, kind: input, shape index: {}]   ;;  %s4691_s9 = inlined_call_operand.vmem [shape: f32[2,1,32], index: 9, kind: input, shape index: {}]   ;;  %s4692_s10 = inlined_call_operand.vmem [shape: f32[2,1,32], index: 10, kind: input, shape index: {}]   ;;  %s4693_s11 = inlined_call_operand.vmem [shape: bf16[2,32,64], index: 11, kind: input, shape index: {}]   ;;  %s4694_s12 = inlined_call_operand.vmem [shape: f32[2,1,64], index: 12, kind: input, shape index: {}]   ;;  %s4695_s13 = inlined_call_operand.vmem [shape: bf16[2,64,32], index: 13, kind: input, shape index: {}]   ;;  %s4696_s14 = inlined_call_operand.vmem [shape: f32[2,1,32], index: 14, kind: input, shape index: {}]   ;;  %s4697_s15 = inlined_call_operand.vmem [shape: f32[2,1,32], index: 15, kind: input, shape index: {}]   ;;  %s4698_s16 = inlined_call_operand.vmem [shape: f32[2,1,32], index: 16, kind: input, shape index: {}]   ;;  %s4699_s17 = inlined_call_operand.vmem [shape: f32[1,32], index: 17, kind: input, shape index: {}]   ;;  %s4700_s18 = inlined_call_operand.vmem [shape: f32[1,32], index: 18, kind: input, shape index: {}]   ;;  %s4701_s19 = inlined_call_operand.hbm [shape: f32[2,8,32], index: 19, kind: output, shape index: {}]  }
   0x1   :  { %4710 = sst [smem:[#allocation13_spill]] %s4682_s0 }
   0x2   :  { %4711 = sst [smem:[#allocation14_spill]] %s4683_s1 }
   0x3   :  { %4712 = sst [smem:[#allocation15_spill]] %s4684_s2 }
   0x4   :  { %4713 = sst [smem:[#allocation16_spill]] %s4685_s3 }
   0x5   :  { %4714 = sst [smem:[#allocation17_spill]] %s4686_s4 }
   0x6   :  { %4715 = sst [smem:[#allocation18_spill]] %s4687_s5 }
   0x7   :  { %4716 = sst [smem:[#allocation19_spill]] %s4688_s6 }
   0x8   :  { %4717 = sst [smem:[#allocation20_spill]] %s4689_s7 }
   0x9   :  { %4718 = sst [smem:[#allocation21_spill]] %s4699_s17 }
   0xa   :  { %4719 = sst [smem:[#allocation22_spill]] %s4700_s18 }
   0xb   :  { %4720 = sst [smem:[#allocation23_spill]] %s4701_s19 }
   0xc   :  { %24 = vsyncpa [#allocation4], 0  ;;  %s4200_s0 = smov 0   ;;  %s4202_s30 = smov 0  }
   0xd   :  { %s4204_s20 = smov 0  }
   0xe LB: > { %4721 = sst [smem:[#allocation6_spill]] %s4085_s0  ;;  %s39_s1 = sadd.s32 1, %s4089_s30  ;;  %s4093_s20 = sphi %s4204_s20, %s30_s20   ;;  %s4089_s30 = sphi %s4202_s30, %s4753_s30   ;;  %s4085_s0 = sphi %s4200_s0, %s4752_s0  }
   0xf   : > { %4722 = sst [smem:[#allocation7_spill]] %s4089_s30  ;;  %p40_p0 = scmp.ge.s32.totalorder %s39_s1, 2 }
  0x10   : > { %4723 = sst [smem:[#allocation8_spill]] %s4093_s20  ;;  %p3389_p1 = scmp.ge.s32.totalorder %s4093_s20, 1 }
  0x11   : > { %p694_p2 = scmp.lt.s32.totalorder %s4093_s20, 3  ;;  %s4755_s1 = smov (%p40_p0, %s39_s1), 0 }
  0x12   : > { %4724 = sst [smem:[#allocation9_spill]] %s4755_s1 }
  0x13   : > { %p695_p3 = pnand %p3389_p1, %p694_p2 }
  0x15   : > { %698 = sbr.rel (%p695_p3) target bundleno = 5423 (0x152f), region = 96 }
  0x1c   : > { %p814_p4 = scmp.lt.s32.totalorder %s4085_s0, 1  ;;  %s4725_s3 = sld [smem:[#allocation14_spill]] }
  0x1d   : > { %s4727_s29 = sld [smem:[#allocation15_spill]]  ;;  %s4729_s19 = sld [smem:[#allocation16_spill]] }
  0x1e   : > { %s4223_s22 = scalar_select %p814_p4, %s4085_s0, 1 }
  0x1f   : > { %s4731_s4 = sld [smem:[#allocation17_spill]]  ;;  %s4732_s5 = sld [smem:[#allocation18_spill]] }
  0x20   : > { %s3568_s2 = sshll.u32 %s4223_s22, 6  ;;  %s3392_s23 = sshll.u32 %s4223_s22, 2 }
  0x21   : > { %s4733_s6 = sld [smem:[#allocation19_spill]]  ;;  %s4734_s7 = sld [smem:[#allocation20_spill]] }
  0x22   : > { %s4230_s26 = scalar_lea.vmem %s4725_s3, %s3568_s2  ;;  %s870_s24 = scalar_lea.vmem %s4696_s14, %s4223_s22 }
  0x23   : > { %4726 = sst [smem:[#allocation10_spill]] %s4230_s26  ;;  %s4235_s21 = scalar_lea.vmem %s4727_s29, %s3392_s23 }
  0x24   : > { %4728 = sst [smem:[#allocation11_spill]] %s4235_s21  ;;  %s4240_s20 = scalar_lea.vmem %s4729_s19, %s3568_s2 }
  0x25   : > { %4730 = sst [smem:[#allocation12_spill]] %s4240_s20  ;;  %s4245_s0 = scalar_lea.vmem %s4731_s4, %s3392_s23 }
  0x26   : > { %s4250_s3 = scalar_lea.vmem %s4732_s5, %s3568_s2  ;;  %s3571_s21 = sshll.u32 %s4223_s22, 4 }
  0x27   : > { %s4255_s29 = scalar_lea.vmem %s4733_s6, %s3392_s23  ;;  %s4265_s17 = scalar_lea.vmem %s4734_s7, %s3571_s21 }
  0x28   : > { %s4278_s5 = scalar_lea.vmem %s4693_s11, %s3571_s21  ;;  %s3573_s20 = sshll.u32 %s4223_s22, 5 }
  0x29   : > { %s4288_s7 = scalar_lea.vmem %s4695_s13, %s3573_s20  ;;  %s873_s23 = scalar_lea.vmem %s4697_s15, %s4223_s22 }
  0x2a   : > { %s876_s2 = scalar_lea.vmem %s4698_s16, %s4223_s22  ;;  %s4735_s30 = sld [smem:[#allocation6_spill]] }
  0x30   : > { %p3405_p5 = scmp.ne.s32.totalorder %s4735_s30, 0 }
  0x31   : > { %s4736_s6 = sld [smem:[#allocation13_spill]] (!%p3405_p5)  ;;  %vm885_vm0 = vcmask (!%p3405_p5), 261120  }
  0x32   : > { %882 = sbr.rel (%p3405_p5) target bundleno = 57 (0x39), region = 100 }
  0x37   : > { %v883_v0 = vld [vmem:[%s4736_s6] sm:$0xff] (!%p3405_p5)  ;;  %v884_v1 = vld [vmem:[%s4736_s6 + $0x8] sm:$0xff] (!%p3405_p5) }
  0x38   : > { %886 = vst.msk [vmem:[#allocation2] sm:$0xff] (!%p3405_p5), %vm885_vm0, %v883_v0  ;;  %887 = vst.msk [vmem:[#allocation2 + $0x8] sm:$0xff] (!%p3405_p5), %vm885_vm0, %v884_v1 }
  0x39 PF: > { %vm892_vm1 = vcmask 261120   ;;  %s4737_s27 = sld [smem:[#allocation10_spill]]  ;;  %s4738_s4 = sld [smem:[#allocation12_spill]]  ;;  %v4095_v18 = vmov 0.0   ;;  %vm4096_vm2 = vmmov 0   ;;  %v3957_v47 = vld [vmem:[%s4250_s3] sm:$0xff]  }
  0x3a   : > { %3682 = vmatprep.subr.bf16.mxu0 %v4095_v18  ;;  %3690 = vmatprep.subr.bf16.mxu1 %v4095_v18  ;;  %s4739_s25 = scalar_lea.vmem %s4691_s9, %s4223_s22  ;;  %s4740_s30 = scalar_lea.vmem %s4692_s10, %s4223_s22  ;;  %v3958_v49 = vld [vmem:[%s4250_s3 + $0x8] sm:$0xff]   ;;  %v3412_v50 = vld [vmem:[%s4245_s0] ss:$0 sm:$0xff]  ;;  %vm1166_vm7 = vcmask 64512   ;;  %vm1286_vm8 = vcmask 1043456   ;;  %vm3036_vm13 = vcmask 523264  }
  0x3b   : > { %3686 = vmatprep.mubr.msk.bf16.mxu0 %vm4096_vm2, %v4095_v18  ;;  %3694 = vmatprep.mubr.msk.bf16.mxu1 %vm4096_vm2, %v4095_v18  ;;  %v3406_v37 = vld [vmem:[%s4739_s25] ss:$0 sm:$0xff]  ;;  %s4741_s1 = sld [smem:[#allocation11_spill]] }
  0x3c   : > { %v3407_v43 = vld [vmem:[%s4740_s30] ss:$0 sm:$0xff] }
  0x3f   : > { %v888_v2 = vld [vmem:[#allocation2] sm:$0xff]  ;;  %v889_v3 = vld [vmem:[#allocation2 + $0x8] sm:$0xff] }
  0x40   : > { %v893_v4 = vsel %vm892_vm1, %v888_v2, 0.0  ;;  %v896_v5 = vsel %vm892_vm1, %v889_v3, 0.0  ;;  %v3953_v16 = vld [vmem:[%s4737_s27] sm:$0xff]   ;;  %v3955_v19 = vld [vmem:[%s4737_s27 + $0x8] sm:$0xff]  }
  0x41   : > { %894 = vadd.xlane.f32.xlu0 %v893_v4  ;;  %v3954_v17 = vld [vmem:[%s4738_s4] sm:$0xff]   ;;  %3683 = vmatpush3.bf16.msra.mxu0 %v3953_v16  ;;  %v3956_v20 = vld [vmem:[%s4738_s4 + $0x8] sm:$0xff]  }
  0x42   : > { %3691 = vmatpush3.bf16.msra.mxu1 %v3954_v17  ;;  %3684 = vmatprep.subr.bf16.mxu0 %v4095_v18  ;;  %v3408_v51 = vld [vmem:[%s4741_s1] ss:$0 sm:$0xff] }
  0x43   : > { %3692 = vmatprep.subr.bf16.mxu1 %v4095_v18 }
  0x45   : > { %897 = vadd.xlane.f32.xlu0 %v896_v5  ;;  %3685 = vmatpush3.bf16.msra.mxu0 %v3955_v19 }
  0x46   : > { %3693 = vmatpush3.bf16.msra.mxu1 %v3956_v20  ;;  %3698 = vmatprep.subr.bf16.mxu0 %v4095_v18 }
  0x47   : > { %3706 = vmatprep.subr.bf16.mxu1 %v4095_v18 }
  0xce   : > { %v895_v6 = vpop.xlane.xlu0 %894 }
  0xcf   : > { %v900_v7 = vmul.f32 0.03125, %v895_v6 }
  0xd1   : > { %v902_v8 = vsub.f32 %v888_v2, %v900_v7 }
  0xd2   : > { %v898_v9 = vpop.xlane.xlu0 %897 }
  0xd3   : > { %v901_v10 = vmul.f32 0.03125, %v898_v9  ;;  %v904_v11 = vmul.f32 %v902_v8, %v902_v8  ;;  %v920_v39 = vmul.f32 %v3406_v37, %v902_v8 }
  0xd5   : > { %v903_v12 = vsub.f32 %v889_v3, %v901_v10  ;;  %v906_v13 = vsel %vm892_vm1, %v904_v11, 0.0  ;;  %v3416_v3 = vld [vmem:[%s4255_s29] ss:$0 sm:$0xff] }
  0xd6   : > { %907 = vadd.xlane.f32.xlu1 %v906_v13 }
  0xd7   : > { %v905_v14 = vmul.f32 %v903_v12, %v903_v12  ;;  %v921_v40 = vmul.f32 %v3406_v37, %v903_v12 }
  0xd9   : > { %v909_v15 = vsel %vm892_vm1, %v905_v14, 0.0 }
  0xda   : > { %910 = vadd.xlane.f32.xlu1 %v909_v15 }
 0x163   : > { %v908_v21 = vpop.xlane.xlu1 %907 }
 0x164   : > { %v912_v22 = vmul.f32 0.032258064, %v908_v21 }
 0x166   : > { %3983 = vrsqrt.f32 %v912_v22  ;;  %vm924_vm3 = vcmp.eq.f32.partialorder %v912_v22, inf  ;;  %v927_v27 = vand.u32 2147483648, %v912_v22  ;;  %vm926_vm4 = vcmp.eq.f32.partialorder %v912_v22, 0.0 }
 0x167   : > { %v911_v23 = vpop.xlane.xlu1 %910 }
 0x168   : > { %v913_v24 = vmul.f32 0.032258064, %v911_v23 }
 0x16a   : > { %3985 = vrsqrt.f32 %v913_v24  ;;  %vm931_vm5 = vcmp.eq.f32.partialorder %v913_v24, inf  ;;  %v934_v33 = vand.u32 2147483648, %v913_v24  ;;  %vm933_vm6 = vcmp.eq.f32.partialorder %v913_v24, 0.0 }
 0x170   : > { %v3984_v25 = vpop.eup %3983 }
 0x171   : > { %v923_v26 = vmul.f32 %v3984_v25, %v912_v22 }
 0x173   : > { %v925_v28 = vsel %vm924_vm3, %v912_v22, %v923_v26 }
 0x174   : > { %v3986_v29 = vpop.eup %3985  ;;  %v928_v30 = vsel %vm926_vm4, %v927_v27, %v925_v28 }
 0x175   : > { %v936_v31 = vadd.f32 1e-06, %v928_v30  ;;  %v930_v32 = vmul.f32 %v3986_v29, %v913_v24 }
 0x177   : > { %3987 = vrcp.f32 %v936_v31  ;;  %v932_v34 = vsel %vm931_vm5, %v913_v24, %v930_v32 }
 0x178   : > { %v935_v35 = vsel %vm933_vm6, %v934_v33, %v932_v34 }
 0x179   : > { %v937_v36 = vadd.f32 1e-06, %v935_v35 }
 0x17b   : > { %3989 = vrcp.f32 %v937_v36 }
 0x181   : > { %v3988_v38 = vpop.eup %3987 }
 0x182   : > { %v939_v41 = vmul.f32 %v3988_v38, %v920_v39 }
 0x184   : > { %v948_v45 = vadd.f32 %v3407_v43, %v939_v41 }
 0x185   : > { %v3990_v42 = vpop.eup %3989 }
 0x186   : > { %v941_v44 = vmul.f32 %v3990_v42, %v921_v40 }
 0x188   : > { %v949_v46 = vadd.f32 %v3407_v43, %v941_v44 }
 0x18a   : > { %v4338_v48 = vpack.c.bf16 %v949_v46, %v948_v45  ;;  %v3959_v45 = vld [vmem:[%s4737_s27 + $0x10] sm:$0xff]  }
 0x18c   : > { %3687 = vmatmul.mubr.msk.bf16.vlgmr.msra.gmra.mrb[0].mxu0 %vm892_vm1, %v4338_v48  ;;  %3695 = vmatmul.mubr.msk.bf16.vlgmr.msra.gmra.mrb[0].mxu1 %vm892_vm1, %v4338_v48 }
 0x18d   : > { %3699 = vmatpush3.bf16.msra.mxu0 %v3957_v47  ;;  %3702 = vmatprep.mubr.msk.bf16.mxu0 %vm4096_vm2, %v4095_v18 }
 0x18e   : > { %3700 = vmatprep.subr.bf16.mxu0 %v4095_v18  ;;  %3708 = vmatprep.mubr.msk.bf16.mxu1 %vm4096_vm2, %v4095_v18 }
 0x191   : > { %3701 = vmatpush3.bf16.msra.mxu0 %v3958_v49  ;;  %v3960_v49 = vld [vmem:[%s4738_s4 + $0x10] sm:$0xff]  }
 0x192   : > { %3712 = vmatprep.subr.bf16.mxu0 %v4095_v18 }
 0x194   : > { %3703 = vmatmul.mubr.msk.bf16.vlgmr.msra.gmra.mrb[4].mxu0 %vm892_vm1, %v4338_v48 }
 0x195   : > { %3714 = vmatprep.mubr.msk.bf16.mxu0 %vm4096_vm2, %v4095_v18 }
 0x25f   : > { %v1011_v52 = vpop.f32.mrb[0].mxu0  ;;  %v1075_v53 = vpop.f32.mrb[0].mxu1 }
 0x260   : > { %v1076_v54 = vadd.f32 %v3412_v50, %v1075_v53  ;;  %v3688_v55 = vpop.f32.mrb[1].mxu0  ;;  %v3696_v56 = vpop.f32.mrb[1].mxu1  ;;  %v1012_v59 = vadd.f32 %v3408_v51, %v1011_v52  ;;  %v3962_v52 = vld [vmem:[%s4738_s4 + $0x18] sm:$0xff]   ;;  %v3963_v53 = vld [vmem:[%s4250_s3 + $0x10] sm:$0xff]  }
 0x261   : > { %v1014_v57 = vpop.f32.mrb[2].mxu0  ;;  %v1078_v58 = vpop.f32.mrb[2].mxu1 }
 0x262   : > { %v3576_v60 = vpack.c.bf16 %v1076_v54, %v1076_v54  ;;  %v1079_v61 = vadd.f32 %v3412_v50, %v1078_v58  ;;  %v3689_v62 = vpop.f32.mrb[3].mxu0  ;;  %v3697_v63 = vpop.f32.mrb[3].mxu1  ;;  %v1015_v1 = vadd.f32 %v3408_v51, %v1014_v57  ;;  %v1146_v4 = vmul.f32 0.35355338, %v1012_v59  ;;  %v3961_v51 = vld [vmem:[%s4737_s27 + $0x18] sm:$0xff]  }
 0x263   : > { %v3964_v54 = vld [vmem:[%s4250_s3 + $0x18] sm:$0xff]  }
 0x264   : > { %v1171_v0 = vsel %vm1166_vm7, %v3576_v60, 0  ;;  %v3577_v2 = vpack.c.bf16 %v1079_v61, %v1079_v61  ;;  %v1147_v7 = vmul.f32 0.35355338, %v1015_v1  ;;  %v3574_v11 = vpack.c.bf16 %v1146_v4, %v1146_v4  ;;  %v3444_v1 = vld [vmem:[%s4245_s0 + $0x1] ss:$0 sm:$0xff] }
 0x265   : > { %3707 = vmatpush3.bf16.xpose.msra.mxu1 %v1171_v0 }
 0x266   : > { %v1217_v5 = vsel %vm1166_vm7, %v3577_v2, 0  ;;  %3718 = vmatprep.subr.bf16.mxu1 %v4095_v18  ;;  %v3575_v15 = vpack.c.bf16 %v1147_v7, %v1147_v7 }
 0x267   : > { %v1139_v6 = vpop.f32.mrb[4].mxu0  ;;  %3713 = vmatpush3.bf16.xpose.msra.mxu0 %v1217_v5 }
 0x268   : > { %v1140_v8 = vadd.f32 %v3416_v3, %v1139_v6  ;;  %v3704_v9 = vpop.f32.mrb[5].mxu0  ;;  %3724 = vmatprep.subr.bf16.mxu0 %v4095_v18 }
 0x269   : > { %v1142_v10 = vpop.f32.mrb[6].mxu0 }
 0x26a   : > { %v3578_v12 = vpack.c.bf16 %v1140_v8, %v1140_v8  ;;  %v1143_v13 = vadd.f32 %v3416_v3, %v1142_v10  ;;  %v3705_v14 = vpop.f32.mrb[7].mxu0  ;;  %v3435_v3 = vld [vmem:[%s4741_s1 + $0x1] ss:$0 sm:$0xff] }
 0x26b   : > { %v3453_v14 = vld [vmem:[%s4255_s29 + $0x1] ss:$0 sm:$0xff] }
 0x26c   : > { %v1288_v16 = vsel %vm1286_vm8, %v3578_v12, 0  ;;  %v3579_v17 = vpack.c.bf16 %v1143_v13, %v1143_v13  ;;  %3709 = vmatmul.mubr.msk.bf16.vlgmr.msra.gmra.mrb[4].mxu1 %vm1166_vm7, %v3574_v11 }
 0x26d   : > { %3719 = vmatpush3.bf16.msra.mxu1 %v1288_v16  ;;  %3720 = vmatprep.mubr.msk.bf16.mxu1 %vm4096_vm2, %v4095_v18 }
 0x26e   : > { %v1334_v19 = vsel %vm1286_vm8, %v3579_v17, 0  ;;  %3715 = vmatmul.mubr.msk.bf16.vlgmr.msra.gmra.mrb[8].mxu0 %vm1166_vm7, %v3575_v15  ;;  %3730 = vmatprep.subr.bf16.mxu1 %v4095_v18 }
 0x26f   : > { %3725 = vmatpush3.bf16.msra.mxu0 %v1334_v19  ;;  %3726 = vmatprep.mubr.msk.bf16.mxu0 %vm4096_vm2, %v4095_v18 }
 0x270   : > { %3738 = vmatprep.subr.bf16.mxu0 %v4095_v18 }
 0x33f   : > { %v1207_v20 = vpop.f32.mrb[4].mxu1 }
 0x340   : > { %v3710_v21 = vpop.f32.mrb[5].mxu1  ;;  %v1259_v22 = vsel %vm1166_vm7, %v1207_v20, -inf }
 0x341   : > { %1260 = vmax.xlane.f32.xlu1 %v1259_v22  ;;  %v1210_v23 = vpop.f32.mrb[6].mxu1  ;;  %v1253_v24 = vpop.f32.mrb[8].mxu0 }
 0x342   : > { %v3711_v25 = vpop.f32.mrb[7].mxu1  ;;  %v3716_v26 = vpop.f32.mrb[9].mxu0  ;;  %v1262_v27 = vsel %vm1166_vm7, %v1253_v24, -inf }
 0x343   : > { %1263 = vmax.xlane.f32.xlu0 %v1262_v27  ;;  %v1256_v28 = vpop.f32.mrb[10].mxu0 }
 0x344   : > { %v3717_v29 = vpop.f32.mrb[11].mxu0 }
 0x3ce   : > { %v1261_v30 = vpop.xlane.xlu1 %1260 }
 0x3cf   : > { %v1265_v31 = vsub.f32 %v1207_v20, %v1261_v30 }
 0x3d0   : > { %v1264_v32 = vpop.xlane.xlu0 %1263 }
 0x3d1   : > { %v1267_v33 = vmul.f32 1.442695, %v1265_v31  ;;  %v1266_v34 = vsub.f32 %v1253_v24, %v1264_v32 }
 0x3d3   : > { %3991 = vpow2.f32 %v1267_v33  ;;  %v1269_v35 = vmul.f32 1.442695, %v1266_v34 }
 0x3d5   : > { %3993 = vpow2.f32 %v1269_v35 }
 0x3dd   : > { %v3992_v36 = vpop.eup %3991 }
 0x3de   : > { %v1271_v37 = vsel %vm1166_vm7, %v3992_v36, 0.0 }
 0x3df   : > { %v3994_v38 = vpop.eup %3993  ;;  %1272 = vadd.xlane.f32.xlu1 %v1271_v37 }
 0x3e0   : > { %v1274_v39 = vsel %vm1166_vm7, %v3994_v38, 0.0 }
 0x3e1   : > { %1275 = vadd.xlane.f32.xlu0 %v1274_v39 }
 0x46c   : > { %v1273_v40 = vpop.xlane.xlu1 %1272 }
 0x46d   : > { %3995 = vrcp.f32 %v1273_v40 }
 0x46e   : > { %v1276_v41 = vpop.xlane.xlu0 %1275 }
 0x46f   : > { %3997 = vrcp.f32 %v1276_v41 }
 0x477   : > { %v3996_v42 = vpop.eup %3995 }
 0x478   : > { %v1279_v43 = vmul.f32 %v3996_v42, %v3992_v36 }
 0x479   : > { %v3998_v44 = vpop.eup %3997 }
 0x47a   : > { %v1280_v46 = vmul.f32 %v3998_v44, %v3994_v38  ;;  %v1281_v47 = vpack.c.bf16 %v1279_v43, %v1279_v43 }
 0x47c   : > { %3721 = vmatmul.mubr.msk.bf16.vlgmr.msra.gmra.mrb[8].mxu1 %vm1166_vm7, %v1281_v47  ;;  %v1282_v50 = vpack.c.bf16 %v1280_v46, %v1280_v46 }
 0x47d   : > { %3731 = vmatpush3.bf16.msra.mxu1 %v3959_v45  ;;  %3734 = vmatprep.mubr.msk.bf16.mxu1 %vm4096_vm2, %v4095_v18 }
 0x47e   : > { %3727 = vmatmul.mubr.msk.bf16.vlgmr.msra.gmra.mrb[12].mxu0 %vm1166_vm7, %v1282_v50  ;;  %3732 = vmatprep.subr.bf16.mxu1 %v4095_v18 }
 0x47f   : > { %3739 = vmatpush3.bf16.msra.mxu0 %v3960_v49  ;;  %3742 = vmatprep.mubr.msk.bf16.mxu0 %vm4096_vm2, %v4095_v18 }
 0x480   : > { %3740 = vmatprep.subr.bf16.mxu0 %v4095_v18 }
 0x481   : > { %3733 = vmatpush3.bf16.msra.mxu1 %v3961_v51 }
 0x482   : > { %3746 = vmatprep.subr.bf16.mxu1 %v4095_v18 }
 0x483   : > { %3741 = vmatpush3.bf16.msra.mxu0 %v3962_v52 }
 0x484   : > { %3735 = vmatmul.mubr.msk.bf16.vlgmr.msra.gmra.mrb[12].mxu1 %vm892_vm1, %v4338_v48  ;;  %3754 = vmatprep.subr.bf16.mxu0 %v4095_v18 }
 0x485   : > { %3747 = vmatpush3.bf16.msra.mxu1 %v3963_v53  ;;  %3750 = vmatprep.mubr.msk.bf16.mxu1 %vm4096_vm2, %v4095_v18 }
 0x486   : > { %3743 = vmatmul.mubr.msk.bf16.vlgmr.msra.gmra.mrb[16].mxu0 %vm892_vm1, %v4338_v48  ;;  %3748 = vmatprep.subr.bf16.mxu1 %v4095_v18 }
 0x487   : > { %3756 = vmatprep.mubr.msk.bf16.mxu0 %vm4096_vm2, %v4095_v18 }
 0x489   : > { %3749 = vmatpush3.bf16.msra.mxu1 %v3964_v54 }
 0x48a   : > { %3760 = vmatprep.subr.bf16.mxu1 %v4095_v18 }
 0x48c   : > { %3751 = vmatmul.mubr.msk.bf16.vlgmr.msra.gmra.mrb[16].mxu1 %vm892_vm1, %v4338_v48 }
 0x48d   : > { %3762 = vmatprep.mubr.msk.bf16.mxu1 %vm4096_vm2, %v4095_v18 }
 0x54f   : > { %v4406_v55 = vpop.f32.mrb[8].mxu1 }
 0x550   : > { %v3722_v56 = vpop.f32.mrb[9].mxu1 }
 0x551   : > { %v1327_v57 = vpop.f32.mrb[10].mxu1  ;;  %v4408_v58 = vpop.f32.mrb[12].mxu0 }
 0x552   : > { %v1376_v59 = vpack.c.bf16 %v4408_v58, %v4406_v55  ;;  %v3723_v60 = vpop.f32.mrb[11].mxu1  ;;  %v3728_v61 = vpop.f32.mrb[13].mxu0 }
 0x553   : > { %v1373_v62 = vpop.f32.mrb[14].mxu0  ;;  %v3467_v61 = vld [vmem:[%s4265_s17 + $0x4] sm:$0xf] }
 0x554   : > { %v3729_v63 = vpop.f32.mrb[15].mxu0 }
 0x557   : > { %v1437_v0 = vpop.f32.mrb[12].mxu1 }
 0x558   : > { %v3736_v2 = vpop.f32.mrb[13].mxu1  ;;  %v1438_v10 = vadd.f32 %v3435_v3, %v1437_v0  ;;  %v1377_v0 = vld [vmem:[%s4265_s17] sm:$0xf] }
 0x559   : > { %v1440_v4 = vpop.f32.mrb[14].mxu1  ;;  %v1503_v5 = vpop.f32.mrb[16].mxu0 }
 0x55a   : > { %v1504_v6 = vadd.f32 %v3444_v1, %v1503_v5  ;;  %v3737_v7 = vpop.f32.mrb[15].mxu1  ;;  %v3744_v8 = vpop.f32.mrb[17].mxu0  ;;  %v1441_v15 = vadd.f32 %v3435_v3, %v1440_v4  ;;  %v1576_v20 = vmul.f32 0.35355338, %v1438_v10  ;;  %v1811_v3 = vsel %vm1286_vm8, %v3467_v61, 0 }
 0x55b   : > { %v1506_v9 = vpop.f32.mrb[18].mxu0  ;;  %v1858_v5 = vsel %vm1286_vm8, %v1377_v0, 0  ;;  %v3966_v7 = vld [vmem:[%s4738_s4 + $0x28] sm:$0xff]  }
 0x55c   : > { %v3582_v11 = vpack.c.bf16 %v1504_v6, %v1504_v6  ;;  %v1507_v12 = vadd.f32 %v3444_v1, %v1506_v9  ;;  %v3745_v13 = vpop.f32.mrb[19].mxu0  ;;  %v1577_v25 = vmul.f32 0.35355338, %v1441_v15  ;;  %v3580_v29 = vpack.c.bf16 %v1576_v20, %v1576_v20  ;;  %v3965_v6 = vld [vmem:[%s4738_s4 + $0x20] sm:$0xff]   ;;  %v3968_v15 = vld [vmem:[%s4737_s27 + $0x28] sm:$0xff]  }
 0x55d   : > { %v3967_v9 = vld [vmem:[%s4737_s27 + $0x20] sm:$0xff]  }
 0x55e   : > { %v1600_v16 = vsel %vm1166_vm7, %v3582_v11, 0  ;;  %v3583_v17 = vpack.c.bf16 %v1507_v12, %v1507_v12  ;;  %v3581_v31 = vpack.c.bf16 %v1577_v25, %v1577_v25 }
 0x55f   : > { %v1569_v19 = vpop.f32.mrb[16].mxu1  ;;  %3755 = vmatpush3.bf16.xpose.msra.mxu0 %v1600_v16 }
 0x560   : > { %v1646_v21 = vsel %vm1166_vm7, %v3583_v17, 0  ;;  %v1570_v22 = vadd.f32 %v3453_v14, %v1569_v19  ;;  %v3752_v23 = vpop.f32.mrb[17].mxu1  ;;  %3766 = vmatprep.subr.bf16.mxu0 %v4095_v18  ;;  %v3969_v17 = vld [vmem:[%s4250_s3 + $0x20] sm:$0xff]  }
 0x561   : > { %v1572_v24 = vpop.f32.mrb[18].mxu1  ;;  %3761 = vmatpush3.bf16.xpose.msra.mxu1 %v1646_v21  ;;  %v3484_v23 = vld [vmem:[%s4245_s0 + $0x2] ss:$0 sm:$0xff] }
 0x562   : > { %v3584_v26 = vpack.c.bf16 %v1570_v22, %v1570_v22  ;;  %v1573_v27 = vadd.f32 %v3453_v14, %v1572_v24  ;;  %v3753_v28 = vpop.f32.mrb[19].mxu1  ;;  %3772 = vmatprep.subr.bf16.mxu1 %v4095_v18  ;;  %v3970_v22 = vld [vmem:[%s4250_s3 + $0x28] sm:$0xff]  }
 0x564   : > { %v3585_v30 = vpack.c.bf16 %v1573_v27, %v1573_v27  ;;  %v1716_v32 = vsel %vm1286_vm8, %v3584_v26, 0 }
 0x566   : > { %3757 = vmatmul.mubr.msk.bf16.vlgmr.msra.gmra.mrb[20].mxu0 %vm1166_vm7, %v3580_v29  ;;  %v1762_v33 = vsel %vm1286_vm8, %v3585_v30, 0 }
 0x567   : > { %3767 = vmatpush3.bf16.msra.mxu0 %v1716_v32  ;;  %3768 = vmatprep.mubr.msk.bf16.mxu0 %vm4096_vm2, %v4095_v18 }
 0x568   : > { %3763 = vmatmul.mubr.msk.bf16.vlgmr.msra.gmra.mrb[20].mxu1 %vm1166_vm7, %v3581_v31  ;;  %3778 = vmatprep.subr.bf16.mxu0 %v4095_v18 }
 0x569   : > { %3773 = vmatpush3.bf16.msra.mxu1 %v1762_v33  ;;  %3774 = vmatprep.mubr.msk.bf16.mxu1 %vm4096_vm2, %v4095_v18 }
 0x56a   : > { %3784 = vmatprep.subr.bf16.mxu1 %v4095_v18 }
 0x639   : > { %v1636_v34 = vpop.f32.mrb[20].mxu0 }
 0x63a   : > { %v3758_v35 = vpop.f32.mrb[21].mxu0  ;;  %v1688_v36 = vsel %vm1166_vm7, %v1636_v34, -inf }
 0x63b   : > { %v1682_v37 = vpop.f32.mrb[20].mxu1  ;;  %1689 = vmax.xlane.f32.xlu0 %v1688_v36  ;;  %v1639_v38 = vpop.f32.mrb[22].mxu0 }
 0x63c   : > { %v3759_v39 = vpop.f32.mrb[23].mxu0  ;;  %v3764_v40 = vpop.f32.mrb[21].mxu1  ;;  %v1691_v41 = vsel %vm1166_vm7, %v1682_v37, -inf }
 0x63d   : > { %1692 = vmax.xlane.f32.xlu1 %v1691_v41  ;;  %v1685_v42 = vpop.f32.mrb[22].mxu1  ;;  %v3475_v40 = vld [vmem:[%s4741_s1 + $0x2] ss:$0 sm:$0xff] }
 0x63e   : > { %v3765_v43 = vpop.f32.mrb[23].mxu1 }
 0x6c8   : > { %v1690_v44 = vpop.xlane.xlu0 %1689 }
 0x6c9   : > { %v1694_v45 = vsub.f32 %v1636_v34, %v1690_v44 }
 0x6ca   : > { %v1693_v46 = vpop.xlane.xlu1 %1692 }
 0x6cb   : > { %v1696_v47 = vmul.f32 1.442695, %v1694_v45  ;;  %v1695_v49 = vsub.f32 %v1682_v37, %v1693_v46 }
 0x6cd   : > { %3999 = vpow2.f32 %v1696_v47  ;;  %v1698_v50 = vmul.f32 1.442695, %v1695_v49 }
 0x6cf   : > { %4001 = vpow2.f32 %v1698_v50 }
 0x6d7   : > { %v4000_v51 = vpop.eup %3999 }
 0x6d8   : > { %v1700_v52 = vsel %vm1166_vm7, %v4000_v51, 0.0 }
 0x6d9   : > { %v4002_v53 = vpop.eup %4001  ;;  %1701 = vadd.xlane.f32.xlu0 %v1700_v52 }
 0x6da   : > { %v1703_v54 = vsel %vm1166_vm7, %v4002_v53, 0.0 }
 0x6db   : > { %1704 = vadd.xlane.f32.xlu1 %v1703_v54 }
 0x766   : > { %v1702_v56 = vpop.xlane.xlu0 %1701 }
 0x767   : > { %4003 = vrcp.f32 %v1702_v56 }
 0x768   : > { %v1705_v57 = vpop.xlane.xlu1 %1704 }
 0x769   : > { %4005 = vrcp.f32 %v1705_v57 }
 0x771   : > { %v4004_v60 = vpop.eup %4003 }
 0x772   : > { %v1708_v62 = vmul.f32 %v4004_v60, %v4000_v51  ;;  %v3493_v51 = vld [vmem:[%s4255_s29 + $0x2] ss:$0 sm:$0xff] }
 0x773   : > { %v4006_v63 = vpop.eup %4005 }
 0x774   : > { %v1709_v1 = vmul.f32 %v4006_v63, %v4002_v53  ;;  %v1710_v2 = vpack.c.bf16 %v1708_v62, %v1708_v62 }
 0x776   : > { %3769 = vmatmul.mubr.msk.bf16.vlgmr.msra.gmra.mrb[24].mxu0 %vm1166_vm7, %v1710_v2  ;;  %v1711_v4 = vpack.c.bf16 %v1709_v1, %v1709_v1 }
 0x777   : > { %3779 = vmatpush3.bf16.msra.mxu0 %v1811_v3  ;;  %3780 = vmatprep.mubr.msk.bf16.mxu0 %vm4096_vm2, %v4095_v18 }
 0x778   : > { %3775 = vmatmul.mubr.msk.bf16.vlgmr.msra.gmra.mrb[24].mxu1 %vm1166_vm7, %v1711_v4  ;;  %3790 = vmatprep.subr.bf16.mxu0 %v4095_v18 }
 0x779   : > { %3785 = vmatpush3.bf16.msra.mxu1 %v1858_v5  ;;  %3786 = vmatprep.mubr.msk.bf16.mxu1 %vm4096_vm2, %v4095_v18 }
 0x77a   : > { %3798 = vmatprep.subr.bf16.mxu1 %v4095_v18 }
 0x780   : > { %3787 = vmatmul.mubr.msk.bf16.vlgmr.msra.gmra.mrb[28].mxu1 %vm1166_vm7, %v1376_v59 }
 0x781   : > { %3799 = vmatpush3.bf16.msra.mxu1 %v3965_v6  ;;  %3802 = vmatprep.mubr.msk.bf16.mxu1 %vm4096_vm2, %v4095_v18 }
 0x782   : > { %3800 = vmatprep.subr.bf16.mxu1 %v4095_v18 }
 0x785   : > { %3801 = vmatpush3.bf16.msra.mxu1 %v3966_v7 }
 0x786   : > { %3814 = vmatprep.subr.bf16.mxu1 %v4095_v18 }
 0x788   : > { %3803 = vmatmul.mubr.msk.bf16.vlgmr.msra.gmra.mrb[32].mxu1 %vm892_vm1, %v4338_v48 }
 0x789   : > { %3816 = vmatprep.mubr.msk.bf16.mxu1 %vm4096_vm2, %v4095_v18 }
 0x849   : > { %v1752_v55 = vpop.f32.mrb[24].mxu0 }
 0x84a   : > { %v3770_v58 = vpop.f32.mrb[25].mxu0 }
 0x84b   : > { %v1755_v59 = vpop.f32.mrb[26].mxu0  ;;  %v1798_v8 = vpop.f32.mrb[24].mxu1 }
 0x84c   : > { %v1804_v10 = vpack.c.bf16 %v1798_v8, %v1752_v55  ;;  %v3771_v11 = vpop.f32.mrb[27].mxu0  ;;  %v3776_v12 = vpop.f32.mrb[25].mxu1 }
 0x84d   : > { %v1801_v13 = vpop.f32.mrb[26].mxu1 }
 0x84e   : > { %v3777_v14 = vpop.f32.mrb[27].mxu1  ;;  %3781 = vmatmul.mubr.msk.bf16.vlgmr.msra.gmra.mrb[28].mxu0 %vm1166_vm7, %v1804_v10 }
 0x84f   : > { %3791 = vmatpush3.bf16.msra.mxu0 %v3967_v9  ;;  %3794 = vmatprep.mubr.msk.bf16.mxu0 %vm4096_vm2, %v4095_v18 }
 0x850   : > { %3792 = vmatprep.subr.bf16.mxu0 %v4095_v18 }
 0x853   : > { %3793 = vmatpush3.bf16.msra.mxu0 %v3968_v15  ;;  %v1894_v16 = vpop.f32.mrb[28].mxu1 }
 0x854   : > { %v3788_v19 = vpop.f32.mrb[29].mxu1  ;;  %3806 = vmatprep.subr.bf16.mxu0 %v4095_v18 }
 0x855   : > { %v1897_v20 = vpop.f32.mrb[30].mxu1 }
 0x856   : > { %v3789_v21 = vpop.f32.mrb[31].mxu1  ;;  %3795 = vmatmul.mubr.msk.bf16.vlgmr.msra.gmra.mrb[32].mxu0 %vm892_vm1, %v4338_v48 }
 0x857   : > { %3807 = vmatpush3.bf16.msra.mxu0 %v3969_v17  ;;  %3810 = vmatprep.mubr.msk.bf16.mxu0 %vm4096_vm2, %v4095_v18 }
 0x858   : > { %3808 = vmatprep.subr.bf16.mxu0 %v4095_v18 }
 0x85b   : > { %3809 = vmatpush3.bf16.msra.mxu0 %v3970_v22  ;;  %v2026_v24 = vpop.f32.mrb[32].mxu1 }
 0x85c   : > { %v2027_v25 = vadd.f32 %v3484_v23, %v2026_v24  ;;  %v3804_v26 = vpop.f32.mrb[33].mxu1  ;;  %3820 = vmatprep.subr.bf16.mxu0 %v4095_v18 }
 0x85d   : > { %v2029_v27 = vpop.f32.mrb[34].mxu1 }
 0x85e   : > { %v3588_v28 = vpack.c.bf16 %v2027_v25, %v2027_v25  ;;  %v2030_v29 = vadd.f32 %v3484_v23, %v2029_v27  ;;  %v3805_v30 = vpop.f32.mrb[35].mxu1  ;;  %3811 = vmatmul.mubr.msk.bf16.vlgmr.msra.gmra.mrb[36].mxu0 %vm892_vm1, %v4338_v48  ;;  %v3507_v23 = vld [vmem:[%s4265_s17 + $0x8] sm:$0xf] }
 0x85f   : > { %3822 = vmatprep.mubr.msk.bf16.mxu0 %vm4096_vm2, %v4095_v18 }
 0x860   : > { %v2123_v31 = vsel %vm1166_vm7, %v3588_v28, 0  ;;  %v3589_v32 = vpack.c.bf16 %v2030_v29, %v2030_v29  ;;  %v2334_v28 = vsel %vm1286_vm8, %v3507_v23, 0  ;;  %v3971_v29 = vld [vmem:[%s4737_s27 + $0x30] sm:$0xff]  }
 0x861   : > { %3815 = vmatpush3.bf16.xpose.msra.mxu1 %v2123_v31  ;;  %v3972_v31 = vld [vmem:[%s4737_s27 + $0x38] sm:$0xff]  }
 0x862   : > { %v2169_v33 = vsel %vm1166_vm7, %v3589_v32, 0  ;;  %3826 = vmatprep.subr.bf16.mxu1 %v4095_v18  ;;  %v3973_v32 = vld [vmem:[%s4250_s3 + $0x30] sm:$0xff]  }
 0x864   : > { %3821 = vmatpush3.bf16.xpose.msra.mxu0 %v2169_v33  ;;  %v3974_v33 = vld [vmem:[%s4250_s3 + $0x38] sm:$0xff]  }
 0x865   : > { %3832 = vmatprep.subr.bf16.mxu0 %v4095_v18 }
 0x921   : > { %v1847_v34 = vpop.f32.mrb[28].mxu0 }
 0x922   : > { %v4483_v35 = vadd.f32 %v1894_v16, %v1847_v34  ;;  %v3782_v36 = vpop.f32.mrb[29].mxu0 }
 0x923   : > { %v1850_v37 = vpop.f32.mrb[30].mxu0 }
 0x924   : > { %v4485_v38 = vadd.f32 %v1897_v20, %v1850_v37  ;;  %v3783_v39 = vpop.f32.mrb[31].mxu0 }
 0x929   : > { %v1960_v41 = vpop.f32.mrb[32].mxu0 }
 0x92a   : > { %v1961_v42 = vadd.f32 %v3475_v40, %v1960_v41  ;;  %v3796_v43 = vpop.f32.mrb[33].mxu0 }
 0x92b   : > { %v1963_v44 = vpop.f32.mrb[34].mxu0 }
 0x92c   : > { %v2099_v45 = vmul.f32 0.35355338, %v1961_v42  ;;  %v1964_v46 = vadd.f32 %v3475_v40, %v1963_v44  ;;  %v3797_v47 = vpop.f32.mrb[35].mxu0  ;;  %v3975_v40 = vld [vmem:[%s4738_s4 + $0x30] sm:$0xff]  }
 0x92e   : > { %v3586_v49 = vpack.c.bf16 %v2099_v45, %v2099_v45  ;;  %v2100_v50 = vmul.f32 0.35355338, %v1964_v46  ;;  %v3976_v46 = vld [vmem:[%s4738_s4 + $0x38] sm:$0xff]   ;;  %s4743_s4 = scalar_lea.vmem %s4694_s12, %s4223_s22 }
 0x930   : > { %v3587_v52 = vpack.c.bf16 %v2100_v50, %v2100_v50  ;;  %3817 = vmatmul.mubr.msk.bf16.vlgmr.msra.gmra.mrb[36].mxu1 %vm1166_vm7, %v3586_v49 }
 0x931   : > { %v2092_v53 = vpop.f32.mrb[36].mxu0  ;;  %3828 = vmatprep.mubr.msk.bf16.mxu1 %vm4096_vm2, %v4095_v18 }
 0x932   : > { %v2093_v54 = vadd.f32 %v3493_v51, %v2092_v53  ;;  %v3812_v56 = vpop.f32.mrb[37].mxu0  ;;  %3823 = vmatmul.mubr.msk.bf16.vlgmr.msra.gmra.mrb[40].mxu0 %vm1166_vm7, %v3587_v52 }
 0x933   : > { %v2095_v57 = vpop.f32.mrb[38].mxu0  ;;  %3834 = vmatprep.mubr.msk.bf16.mxu0 %vm4096_vm2, %v4095_v18 }
 0x934   : > { %v3590_v60 = vpack.c.bf16 %v2093_v54, %v2093_v54  ;;  %v2096_v61 = vadd.f32 %v3493_v51, %v2095_v57  ;;  %v3813_v62 = vpop.f32.mrb[39].mxu0 }
 0x936   : > { %v2239_v63 = vsel %vm1286_vm8, %v3590_v60, 0  ;;  %v3591_v0 = vpack.c.bf16 %v2096_v61, %v2096_v61 }
 0x937   : > { %3827 = vmatpush3.bf16.msra.mxu1 %v2239_v63 }
 0x938   : > { %v2285_v1 = vsel %vm1286_vm8, %v3591_v0, 0  ;;  %3838 = vmatprep.subr.bf16.mxu1 %v4095_v18 }
 0x939   : > { %3833 = vmatpush3.bf16.msra.mxu0 %v2285_v1  ;;  %v3523_v1 = vld [vmem:[%s4245_s0 + $0x3] ss:$0 sm:$0xff] }
 0x93a   : > { %3844 = vmatprep.subr.bf16.mxu0 %v4095_v18 }
 0xa03   : > { %v2159_v2 = vpop.f32.mrb[36].mxu1 }
 0xa04   : > { %v3818_v3 = vpop.f32.mrb[37].mxu1  ;;  %v2211_v4 = vsel %vm1166_vm7, %v2159_v2, -inf }
 0xa05   : > { %2212 = vmax.xlane.f32.xlu0 %v2211_v4  ;;  %v2162_v5 = vpop.f32.mrb[38].mxu1  ;;  %v2205_v6 = vpop.f32.mrb[40].mxu0 }
 0xa06   : > { %v3819_v7 = vpop.f32.mrb[39].mxu1  ;;  %v3824_v55 = vpop.f32.mrb[41].mxu0  ;;  %v2214_v58 = vsel %vm1166_vm7, %v2205_v6, -inf  ;;  %v3532_v5 = vld [vmem:[%s4255_s29 + $0x3] ss:$0 sm:$0xff]  ;;  %s4742_s29 = scalar_lea.vmem %s4690_s8, %s4223_s22 }
 0xa07   : > { %2215 = vmax.xlane.f32.xlu1 %v2214_v58  ;;  %v2208_v59 = vpop.f32.mrb[42].mxu0 }
 0xa08   : > { %v3825_v8 = vpop.f32.mrb[43].mxu0 }
 0xa92   : > { %v2213_v9 = vpop.xlane.xlu0 %2212 }
 0xa93   : > { %v2217_v10 = vsub.f32 %v2159_v2, %v2213_v9 }
 0xa94   : > { %v2216_v11 = vpop.xlane.xlu1 %2215 }
 0xa95   : > { %v2219_v12 = vmul.f32 1.442695, %v2217_v10  ;;  %v2218_v13 = vsub.f32 %v2205_v6, %v2216_v11 }
 0xa97   : > { %4007 = vpow2.f32 %v2219_v12  ;;  %v2221_v14 = vmul.f32 1.442695, %v2218_v13 }
 0xa99   : > { %4009 = vpow2.f32 %v2221_v14 }
 0xaa1   : > { %v4008_v15 = vpop.eup %4007 }
 0xaa2   : > { %v2223_v16 = vsel %vm1166_vm7, %v4008_v15, 0.0 }
 0xaa3   : > { %v4010_v17 = vpop.eup %4009  ;;  %2224 = vadd.xlane.f32.xlu0 %v2223_v16 }
 0xaa4   : > { %v2226_v19 = vsel %vm1166_vm7, %v4010_v17, 0.0 }
 0xaa5   : > { %2227 = vadd.xlane.f32.xlu1 %v2226_v19 }
 0xb30   : > { %v2225_v20 = vpop.xlane.xlu0 %2224 }
 0xb31   : > { %4011 = vrcp.f32 %v2225_v20 }
 0xb32   : > { %v2228_v21 = vpop.xlane.xlu1 %2227 }
 0xb33   : > { %4013 = vrcp.f32 %v2228_v21 }
 0xb3b   : > { %v4012_v22 = vpop.eup %4011 }
 0xb3c   : > { %v2231_v24 = vmul.f32 %v4012_v22, %v4008_v15 }
 0xb3d   : > { %v4014_v25 = vpop.eup %4013 }
 0xb3e   : > { %v2232_v26 = vmul.f32 %v4014_v25, %v4010_v17  ;;  %v2233_v27 = vpack.c.bf16 %v2231_v24, %v2231_v24 }
 0xb40   : > { %3829 = vmatmul.mubr.msk.bf16.vlgmr.msra.gmra.mrb[40].mxu1 %vm1166_vm7, %v2233_v27  ;;  %v2234_v30 = vpack.c.bf16 %v2232_v26, %v2232_v26 }
 0xb41   : > { %3839 = vmatpush3.bf16.msra.mxu1 %v2334_v28  ;;  %3840 = vmatprep.mubr.msk.bf16.mxu1 %vm4096_vm2, %v4095_v18 }
 0xb42   : > { %3835 = vmatmul.mubr.msk.bf16.vlgmr.msra.gmra.mrb[44].mxu0 %vm1166_vm7, %v2234_v30  ;;  %3852 = vmatprep.subr.bf16.mxu1 %v4095_v18 }
 0xb43   : > { %3845 = vmatpush3.bf16.msra.mxu0 %v3971_v29  ;;  %3848 = vmatprep.mubr.msk.bf16.mxu0 %vm4096_vm2, %v4095_v18 }
 0xb44   : > { %3846 = vmatprep.subr.bf16.mxu0 %v4095_v18 }
 0xb47   : > { %3847 = vmatpush3.bf16.msra.mxu0 %v3972_v31 }
 0xb48   : > { %3860 = vmatprep.subr.bf16.mxu0 %v4095_v18 }
 0xb4a   : > { %3849 = vmatmul.mubr.msk.bf16.vlgmr.msra.gmra.mrb[48].mxu0 %vm892_vm1, %v4338_v48 }
 0xb4b   : > { %3861 = vmatpush3.bf16.msra.mxu0 %v3973_v32  ;;  %3864 = vmatprep.mubr.msk.bf16.mxu0 %vm4096_vm2, %v4095_v18 }
 0xb4c   : > { %3862 = vmatprep.subr.bf16.mxu0 %v4095_v18 }
 0xb4f   : > { %3863 = vmatpush3.bf16.msra.mxu0 %v3974_v33 }
 0xb50   : > { %3874 = vmatprep.subr.bf16.mxu0 %v4095_v18 }
 0xb52   : > { %3865 = vmatmul.mubr.msk.bf16.vlgmr.msra.gmra.mrb[52].mxu0 %vm892_vm1, %v4338_v48 }
 0xb53   : > { %3876 = vmatprep.mubr.msk.bf16.mxu0 %vm4096_vm2, %v4095_v18 }
 0xc13   : > { %v2275_v34 = vpop.f32.mrb[40].mxu1 }
 0xc14   : > { %v3830_v36 = vpop.f32.mrb[41].mxu1 }
 0xc15   : > { %v2278_v37 = vpop.f32.mrb[42].mxu1  ;;  %v2321_v39 = vpop.f32.mrb[44].mxu0 }
 0xc16   : > { %v2327_v41 = vpack.c.bf16 %v2321_v39, %v2275_v34  ;;  %v3831_v42 = vpop.f32.mrb[43].mxu1  ;;  %v3836_v43 = vpop.f32.mrb[45].mxu0 }
 0xc17   : > { %v2324_v44 = vpop.f32.mrb[46].mxu0 }
 0xc18   : > { %v3837_v45 = vpop.f32.mrb[47].mxu0  ;;  %3841 = vmatmul.mubr.msk.bf16.vlgmr.msra.gmra.mrb[44].mxu1 %vm1166_vm7, %v2327_v41 }
 0xc19   : > { %3853 = vmatpush3.bf16.msra.mxu1 %v3975_v40  ;;  %3856 = vmatprep.mubr.msk.bf16.mxu1 %vm4096_vm2, %v4095_v18 }
 0xc1a   : > { %3854 = vmatprep.subr.bf16.mxu1 %v4095_v18 }
 0xc1d   : > { %v2438_v47 = vpop.f32.mrb[48].mxu0  ;;  %3855 = vmatpush3.bf16.msra.mxu1 %v3976_v46  ;;  %v3546_v46 = vld [vmem:[%s4265_s17 + $0xc] sm:$0xf] }
 0xc1e   : > { %v3850_v49 = vpop.f32.mrb[49].mxu0  ;;  %3868 = vmatprep.subr.bf16.mxu1 %v4095_v18 }
 0xc1f   : > { %v2441_v50 = vpop.f32.mrb[50].mxu0 }
 0xc20   : > { %v3851_v51 = vpop.f32.mrb[51].mxu0  ;;  %3857 = vmatmul.mubr.msk.bf16.vlgmr.msra.gmra.mrb[48].mxu1 %vm892_vm1, %v4338_v48  ;;  %v3514_v48 = vld [vmem:[%s4741_s1 + $0x3] ss:$0 sm:$0xff] }
 0xc21   : > { %3870 = vmatprep.mubr.msk.bf16.mxu1 %vm4096_vm2, %v4095_v18  ;;  %v2439_v7 = vadd.f32 %v3514_v48, %v2438_v47  ;;  %v2442_v8 = vadd.f32 %v3514_v48, %v2441_v50 }
 0xc23   : > { %v2578_v13 = vmul.f32 0.35355338, %v2442_v8 }
 0xc25   : > { %v2570_v52 = vpop.f32.mrb[52].mxu0  ;;  %v3593_v17 = vpack.c.bf16 %v2578_v13, %v2578_v13 }
 0xc26   : > { %v3866_v53 = vpop.f32.mrb[53].mxu0 }
 0xc27   : > { %v2573_v54 = vpop.f32.mrb[54].mxu0 }
 0xc28   : > { %v3867_v56 = vpop.f32.mrb[55].mxu0  ;;  %v2574_v11 = vadd.f32 %v3532_v5, %v2573_v54 }
 0xc2a   : > { %v3597_v16 = vpack.c.bf16 %v2574_v11, %v2574_v11 }
 0xc2c   : > { %v2763_v20 = vsel %vm1286_vm8, %v3597_v16, 0 }
 0xceb   : > { %v2370_v57 = vpop.f32.mrb[44].mxu1 }
 0xcec   : > { %v4540_v60 = vadd.f32 %v2370_v57, %v4483_v35  ;;  %v3842_v61 = vpop.f32.mrb[45].mxu1  ;;  %v2571_v35 = vadd.f32 %v3532_v5, %v2570_v52  ;;  %v2812_v52 = vsel %vm1286_vm8, %v3546_v46, 0 }
 0xced   : > { %v2373_v62 = vpop.f32.mrb[46].mxu1 }
 0xcee   : > { %v4543_v63 = vadd.f32 %v2373_v62, %v4485_v38  ;;  %v3843_v0 = vpop.f32.mrb[47].mxu1  ;;  %v2577_v38 = vmul.f32 0.35355338, %v2439_v7  ;;  %v3596_v14 = vpack.c.bf16 %v2571_v35, %v2571_v35 }
 0xcf0   : > { %v3592_v15 = vpack.c.bf16 %v2577_v38, %v2577_v38  ;;  %v2717_v19 = vsel %vm1286_vm8, %v3596_v14, 0 }
 0xcf3   : > { %v2504_v2 = vpop.f32.mrb[48].mxu1 }
 0xcf4   : > { %v2505_v3 = vadd.f32 %v3523_v1, %v2504_v2  ;;  %v3858_v4 = vpop.f32.mrb[49].mxu1 }
 0xcf5   : > { %v2507_v6 = vpop.f32.mrb[50].mxu1 }
 0xcf6   : > { %v3594_v55 = vpack.c.bf16 %v2505_v3, %v2505_v3  ;;  %v2508_v58 = vadd.f32 %v3523_v1, %v2507_v6  ;;  %v3859_v59 = vpop.f32.mrb[51].mxu1  ;;  %v3548_v6 = vld [vmem:[%s4742_s29] ss:$0 sm:$0xff] }
 0xcf8   : > { %v2601_v9 = vsel %vm1166_vm7, %v3594_v55, 0  ;;  %v3595_v10 = vpack.c.bf16 %v2508_v58, %v2508_v58  ;;  %v4031_v55 = vld [vmem:[#allocation2] sm:$0xff] }
 0xcf9   : > { %3869 = vmatpush3.bf16.xpose.msra.mxu1 %v2601_v9  ;;  %v4032_v9 = vld [vmem:[#allocation2 + $0x8] sm:$0xff] }
 0xcfa   : > { %v2647_v12 = vsel %vm1166_vm7, %v3595_v10, 0  ;;  %3880 = vmatprep.subr.bf16.mxu1 %v4095_v18 }
 0xcfb   : > { %3875 = vmatpush3.bf16.xpose.msra.mxu0 %v2647_v12 }
 0xcfc   : > { %3886 = vmatprep.subr.bf16.mxu0 %v4095_v18 }
 0xd00   : > { %3871 = vmatmul.mubr.msk.bf16.vlgmr.msra.gmra.mrb[52].mxu1 %vm1166_vm7, %v3592_v15 }
 0xd01   : > { %3881 = vmatpush3.bf16.msra.mxu1 %v2717_v19  ;;  %3882 = vmatprep.mubr.msk.bf16.mxu1 %vm4096_vm2, %v4095_v18 }
 0xd02   : > { %3877 = vmatmul.mubr.msk.bf16.vlgmr.msra.gmra.mrb[56].mxu0 %vm1166_vm7, %v3593_v17  ;;  %3892 = vmatprep.subr.bf16.mxu1 %v4095_v18 }
 0xd03   : > { %3887 = vmatpush3.bf16.msra.mxu0 %v2763_v20  ;;  %3888 = vmatprep.mubr.msk.bf16.mxu0 %vm4096_vm2, %v4095_v18 }
 0xd04   : > { %3898 = vmatprep.subr.bf16.mxu0 %v4095_v18 }
 0xdd3   : > { %v2637_v21 = vpop.f32.mrb[52].mxu1 }
 0xdd4   : > { %v3872_v22 = vpop.f32.mrb[53].mxu1  ;;  %v2689_v23 = vsel %vm1166_vm7, %v2637_v21, -inf }
 0xdd5   : > { %2690 = vmax.xlane.f32.xlu0 %v2689_v23  ;;  %v2640_v24 = vpop.f32.mrb[54].mxu1  ;;  %v2683_v25 = vpop.f32.mrb[56].mxu0  ;;  %v3977_v22 = vld [vmem:[%s4278_s5] sm:$0xff]   ;;  %v3978_v23 = vld [vmem:[%s4278_s5 + $0x8] sm:$0xff]  }
 0xdd6   : > { %v3873_v26 = vpop.f32.mrb[55].mxu1  ;;  %v3878_v27 = vpop.f32.mrb[57].mxu0  ;;  %v2692_v28 = vsel %vm1166_vm7, %v2683_v25, -inf  ;;  %v3979_v24 = vld [vmem:[%s4288_s7] sm:$0xff]  }
 0xdd7   : > { %2693 = vmax.xlane.f32.xlu1 %v2692_v28  ;;  %v2686_v29 = vpop.f32.mrb[58].mxu0 }
 0xdd8   : > { %v3879_v30 = vpop.f32.mrb[59].mxu0 }
 0xe62   : > { %v2691_v31 = vpop.xlane.xlu0 %2690 }
 0xe63   : > { %v2695_v32 = vsub.f32 %v2637_v21, %v2691_v31 }
 0xe64   : > { %v2694_v33 = vpop.xlane.xlu1 %2693 }
 0xe65   : > { %v2697_v34 = vmul.f32 1.442695, %v2695_v32  ;;  %v2696_v36 = vsub.f32 %v2683_v25, %v2694_v33  ;;  %v3980_v25 = vld [vmem:[%s4288_s7 + $0x8] sm:$0xff]  }
 0xe67   : > { %4015 = vpow2.f32 %v2697_v34  ;;  %v2699_v37 = vmul.f32 1.442695, %v2696_v36 }
 0xe69   : > { %4017 = vpow2.f32 %v2699_v37 }
 0xe71   : > { %v4016_v39 = vpop.eup %4015 }
 0xe72   : > { %v2701_v40 = vsel %vm1166_vm7, %v4016_v39, 0.0 }
 0xe73   : > { %v4018_v41 = vpop.eup %4017  ;;  %2702 = vadd.xlane.f32.xlu0 %v2701_v40 }
 0xe74   : > { %v2704_v42 = vsel %vm1166_vm7, %v4018_v41, 0.0 }
 0xe75   : > { %2705 = vadd.xlane.f32.xlu1 %v2704_v42 }
 0xf00   : > { %v2703_v43 = vpop.xlane.xlu0 %2702 }
 0xf01   : > { %4019 = vrcp.f32 %v2703_v43 }
 0xf02   : > { %v2706_v44 = vpop.xlane.xlu1 %2705 }
 0xf03   : > { %4021 = vrcp.f32 %v2706_v44  ;;  %v3549_v44 = vld [vmem:[%s873_s23] ss:$0 sm:$0xff] }
 0xf0b   : > { %v4020_v45 = vpop.eup %4019 }
 0xf0c   : > { %v2709_v47 = vmul.f32 %v4020_v45, %v4016_v39 }
 0xf0d   : > { %v4022_v49 = vpop.eup %4021 }
 0xf0e   : > { %v2710_v50 = vmul.f32 %v4022_v49, %v4018_v41  ;;  %v2711_v51 = vpack.c.bf16 %v2709_v47, %v2709_v47 }
 0xf10   : > { %3883 = vmatmul.mubr.msk.bf16.vlgmr.msra.gmra.mrb[56].mxu1 %vm1166_vm7, %v2711_v51  ;;  %v2712_v53 = vpack.c.bf16 %v2710_v50, %v2710_v50  ;;  %v3550_v51 = vld [vmem:[%s876_s2] ss:$0 sm:$0xff] }
 0xf11   : > { %3893 = vmatpush3.bf16.msra.mxu1 %v2812_v52  ;;  %3894 = vmatprep.mubr.msk.bf16.mxu1 %vm4096_vm2, %v4095_v18 }
 0xf12   : > { %3889 = vmatmul.mubr.msk.bf16.vlgmr.msra.gmra.mrb[60].mxu0 %vm1166_vm7, %v2712_v53  ;;  %3906 = vmatprep.subr.bf16.mxu1 %v4095_v18 }
 0xf13   : > { %3902 = vmatprep.mubr.msk.bf16.mxu0 %vm4096_vm2, %v4095_v18  ;;  %3899 = vmatpush3.bf16.msra.mxu0 %v3977_v22 }
 0xf14   : > { %3900 = vmatprep.subr.bf16.mxu0 %v4095_v18 }
 0xf17   : > { %3901 = vmatpush3.bf16.msra.mxu0 %v3978_v23 }
 0xfe3   : > { %v2753_v54 = vpop.f32.mrb[56].mxu1 }
 0xfe4   : > { %v3884_v56 = vpop.f32.mrb[57].mxu1 }
 0xfe5   : > { %v2756_v57 = vpop.f32.mrb[58].mxu1  ;;  %v2799_v61 = vpop.f32.mrb[60].mxu0 }
 0xfe6   : > { %v2805_v62 = vpack.c.bf16 %v2799_v61, %v2753_v54  ;;  %v3885_v0 = vpop.f32.mrb[59].mxu1  ;;  %v3890_v1 = vpop.f32.mrb[61].mxu0  ;;  %v3981_v57 = vld [vmem:[%s4288_s7 + $0x10] sm:$0xff]   ;;  %v3982_v61 = vld [vmem:[%s4288_s7 + $0x18] sm:$0xff]   ;;  %s4744_s7 = sld [smem:[#allocation6_spill]] }
 0xfe7   : > { %v2802_v48 = vpop.f32.mrb[62].mxu0 }
 0xfe8   : > { %v3891_v2 = vpop.f32.mrb[63].mxu0  ;;  %3895 = vmatmul.mubr.msk.bf16.vlgmr.msra.gmra.mrb[60].mxu1 %vm1166_vm7, %v2805_v62  ;;  %v3551_v62 = vld [vmem:[%s4743_s4] ss:$0 sm:$0xff] }
 0xfe9   : > { %3914 = vmatprep.mubr.msk.bf16.mxu1 %vm4096_vm2, %v4095_v18  ;;  %3907 = vmatpush3.bf16.msra.mxu1 %v3979_v24 }
 0xfea   : > { %3908 = vmatprep.subr.bf16.mxu1 %v4095_v18 }
 0xfec   : > { %p3561_p6 = scmp.ne.s32.totalorder %s4744_s7, 1 }
 0xfed   : > { %3909 = vmatpush3.bf16.msra.mxu1 %v3980_v25  ;;  %s4745_s18 = sld [smem:[#allocation21_spill]] (!%p3561_p6)  ;;  %s4746_s28 = sld [smem:[#allocation22_spill]] (!%p3561_p6) }
 0xfee   : > { %3910 = vmatprep.subr.bf16.mxu1 %v4095_v18 }
 0xff1   : > { %3911 = vmatpush3.bf16.msra.mxu1 %v3981_v57 }
 0xff2   : > { %3912 = vmatprep.subr.bf16.mxu1 %v4095_v18  ;;  %v3555_v18 = vld [vmem:[%s870_s24] ss:$0 sm:$0xff] }
 0xff5   : > { %3913 = vmatpush3.bf16.msra.mxu1 %v3982_v61 }
0x10bb   : > { %v2848_v3 = vpop.f32.mrb[60].mxu1 }
0x10bc   : > { %v2855_v4 = vadd.f32 %v2848_v3, %v4540_v60  ;;  %v3896_v5 = vpop.f32.mrb[61].mxu1 }
0x10bd   : > { %v2851_v7 = vpop.f32.mrb[62].mxu1 }
0x10be   : > { %v2857_v58 = vadd.f32 %v4031_v55, %v2855_v4  ;;  %v2856_v59 = vadd.f32 %v2851_v7, %v4543_v63  ;;  %v3897_v8 = vpop.f32.mrb[63].mxu1 }
0x10c0   : > { %v4585_v35 = vadd.f32 %v3548_v6, %v2857_v58  ;;  %v2858_v10 = vadd.f32 %v4032_v9, %v2856_v59 }
0x10c2   : > { %v4587_v38 = vadd.f32 %v3548_v6, %v2858_v10  ;;  %v2870_v60 = vsel %vm892_vm1, %v4585_v35, 0.0 }
0x10c3   : > { %2871 = vadd.xlane.f32.xlu0 %v2870_v60 }
0x10c4   : > { %v2873_v11 = vsel %vm892_vm1, %v4587_v38, 0.0 }
0x10c5   : > { %2874 = vadd.xlane.f32.xlu1 %v2873_v11 }
0x1150   : > { %v2872_v12 = vpop.xlane.xlu0 %2871 }
0x1151   : > { %v2876_v13 = vmul.f32 0.03125, %v2872_v12 }
0x1152   : > { %v2875_v63 = vpop.xlane.xlu1 %2874 }
0x1153   : > { %v2878_v14 = vsub.f32 %v4585_v35, %v2876_v13  ;;  %v2877_v15 = vmul.f32 0.03125, %v2875_v63 }
0x1155   : > { %v2879_v16 = vsub.f32 %v4587_v38, %v2877_v15  ;;  %v2880_v17 = vmul.f32 %v2878_v14, %v2878_v14  ;;  %v2896_v46 = vmul.f32 %v3549_v44, %v2878_v14 }
0x1157   : > { %v2882_v19 = vsel %vm892_vm1, %v2880_v17, 0.0  ;;  %v2881_v20 = vmul.f32 %v2879_v16, %v2879_v16  ;;  %v2897_v47 = vmul.f32 %v3549_v44, %v2879_v16 }
0x1158   : > { %2883 = vadd.xlane.f32.xlu0 %v2882_v19 }
0x1159   : > { %v2885_v21 = vsel %vm892_vm1, %v2881_v20, 0.0 }
0x115a   : > { %2886 = vadd.xlane.f32.xlu1 %v2885_v21 }
0x11e5   : > { %v2884_v26 = vpop.xlane.xlu0 %2883 }
0x11e6   : > { %v2888_v27 = vmul.f32 0.032258064, %v2884_v26 }
0x11e7   : > { %v2887_v28 = vpop.xlane.xlu1 %2886 }
0x11e8   : > { %4023 = vrsqrt.f32 %v2888_v27  ;;  %v2889_v29 = vmul.f32 0.032258064, %v2887_v28  ;;  %vm2900_vm9 = vcmp.eq.f32.partialorder %v2888_v27, inf  ;;  %v2903_v32 = vand.u32 2147483648, %v2888_v27 }
0x11e9   : > { %vm2902_vm10 = vcmp.eq.f32.partialorder %v2888_v27, 0.0 }
0x11ea   : > { %4025 = vrsqrt.f32 %v2889_v29  ;;  %vm2907_vm11 = vcmp.eq.f32.partialorder %v2889_v29, inf  ;;  %v2910_v40 = vand.u32 2147483648, %v2889_v29  ;;  %vm2909_vm12 = vcmp.eq.f32.partialorder %v2889_v29, 0.0 }
0x11f2   : > { %v4024_v30 = vpop.eup %4023 }
0x11f3   : > { %v2899_v31 = vmul.f32 %v4024_v30, %v2888_v27 }
0x11f4   : > { %v4026_v33 = vpop.eup %4025 }
0x11f5   : > { %v2901_v34 = vsel %vm2900_vm9, %v2888_v27, %v2899_v31  ;;  %v2906_v37 = vmul.f32 %v4026_v33, %v2889_v29 }
0x11f6   : > { %v2904_v36 = vsel %vm2902_vm10, %v2903_v32, %v2901_v34 }
0x11f7   : > { %v2912_v39 = vadd.f32 1e-06, %v2904_v36  ;;  %v2908_v41 = vsel %vm2907_vm11, %v2889_v29, %v2906_v37 }
0x11f8   : > { %v2911_v42 = vsel %vm2909_vm12, %v2910_v40, %v2908_v41  ;;  %v3562_v40 = vld [vmem:[%s4745_s18] ss:$0 sm:$0xff] (!%p3561_p6) }
0x11f9   : > { %4027 = vrcp.f32 %v2912_v39  ;;  %v2913_v43 = vadd.f32 1e-06, %v2911_v42 }
0x11fb   : > { %4029 = vrcp.f32 %v2913_v43  ;;  %v3563_v43 = vld [vmem:[%s4746_s28] ss:$0 sm:$0xff] (!%p3561_p6) }
0x1203   : > { %v4028_v45 = vpop.eup %4027 }
0x1204   : > { %v2915_v49 = vmul.f32 %v4028_v45, %v2896_v46 }
0x1205   : > { %v4030_v50 = vpop.eup %4029 }
0x1206   : > { %v2917_v52 = vmul.f32 %v4030_v50, %v2897_v47  ;;  %v2924_v53 = vadd.f32 %v3550_v51, %v2915_v49 }
0x1208   : > { %v2925_v54 = vadd.f32 %v3550_v51, %v2917_v52 }
0x120a   : > { %v2926_v56 = vpack.c.bf16 %v2925_v54, %v2924_v53 }
0x120c   : > { %3903 = vmatmul.mubr.msk.bf16.vlgmr.msra.gmra.mrb[64].mxu0 %vm892_vm1, %v2926_v56 }
0x12df   : > { %v2987_v0 = vpop.f32.mrb[64].mxu0 }
0x12e0   : > { %v2988_v1 = vadd.f32 %v3551_v62, %v2987_v0  ;;  %v3904_v48 = vpop.f32.mrb[65].mxu0 }
0x12e1   : > { %v2990_v2 = vpop.f32.mrb[66].mxu0 }
0x12e2   : > { %v2991_v3 = vadd.f32 %v3551_v62, %v2990_v2  ;;  %v3905_v4 = vpop.f32.mrb[67].mxu0  ;;  %v2994_v5 = vmax.f32 %v2988_v1, 0.0 }
0x12e4   : > { %v2995_v6 = vmax.f32 %v2991_v3, 0.0 }
0x12e6   : > { %v2996_v7 = vpack.c.bf16 %v2995_v6, %v2994_v5 }
0x12e8   : > { %3915 = vmatmul.mubr.msk.bf16.vlgmr.msra.gmra.mrb[64].mxu1 %vm3036_vm13, %v2996_v7 }
0x13bb   : > { %v3074_v55 = vpop.f32.mrb[64].mxu1 }
0x13bc   : > { %v3075_v58 = vadd.f32 %v3555_v18, %v3074_v55  ;;  %v3916_v59 = vpop.f32.mrb[65].mxu1  ;;  %3088 = sbr.rel (%p3561_p6) target bundleno = 5387 (0x150b), region = 104 }
0x13bd   : > { %v3077_v8 = vpop.f32.mrb[66].mxu1 }
0x13be   : > { %v3081_v9 = vadd.f32 %v3075_v58, %v4585_v35  ;;  %v3078_v10 = vadd.f32 %v3555_v18, %v3077_v8  ;;  %v3917_v60 = vpop.f32.mrb[67].mxu1 }
0x13c0   : > { %3083 = vst.msk [vmem:[#allocation2] sm:$0xff] %vm892_vm1, %v3081_v9  ;;  %v3082_v11 = vadd.f32 %v3078_v10, %v4587_v38  ;;  %v3091_v12 = vsel (!%p3561_p6), %vm892_vm1, %v3081_v9, 0.0 }
0x13c1   : > { %3092 = vadd.xlane.f32.xlu0 (!%p3561_p6), %v3091_v12 }
0x13c2   : > { %3084 = vst.msk [vmem:[#allocation2 + $0x8] sm:$0xff] %vm892_vm1, %v3082_v11  ;;  %v3094_v13 = vsel (!%p3561_p6), %vm892_vm1, %v3082_v11, 0.0 }
0x13c5   : > { %3095 = vadd.xlane.f32.xlu0 %v3094_v13 }
0x144e   : > { %v3093_v63 = vpop.xlane.xlu0 %3092 }
0x144f   : > { %v3097_v14 = vmul.f32 0.03125, %v3093_v63 }
0x1451   : > { %v3099_v35 = vsub.f32 %v3081_v9, %v3097_v14 }
0x1452   : > { %v3096_v15 = vpop.xlane.xlu0 %3095 }
0x1453   : > { %v3098_v16 = vmul.f32 0.03125, %v3096_v15  ;;  %v3101_v17 = vmul.f32 %v3099_v35, %v3099_v35  ;;  %v3117_v41 = vmul.f32 %v3562_v40, %v3099_v35 }
0x1455   : > { %v3100_v19 = vsub.f32 %v3082_v11, %v3098_v16  ;;  %v3103_v38 = vsel %vm892_vm1, %v3101_v17, 0.0 }
0x1456   : > { %3104 = vadd.xlane.f32.xlu1 %v3103_v38 }
0x1457   : > { %v3102_v20 = vmul.f32 %v3100_v19, %v3100_v19  ;;  %v3118_v45 = vmul.f32 %v3562_v40, %v3100_v19 }
0x1459   : > { %v3106_v21 = vsel %vm892_vm1, %v3102_v20, 0.0 }
0x145a   : > { %3107 = vadd.xlane.f32.xlu1 %v3106_v21 }
0x14e3   : > { %v3105_v22 = vpop.xlane.xlu1 %3104 }
0x14e4   : > { %v3109_v23 = vmul.f32 0.032258064, %v3105_v22 }
0x14e6   : > { %4033 = vrsqrt.f32 %v3109_v23  ;;  %vm3121_vm14 = vcmp.eq.f32.partialorder %v3109_v23, inf  ;;  %v3124_v28 = vand.u32 2147483648, %v3109_v23  ;;  %vm3123_vm15 = vcmp.eq.f32.partialorder %v3109_v23, 0.0 }
0x14e7   : > { %v3108_v24 = vpop.xlane.xlu1 %3107 }
0x14e8   : > { %v3110_v25 = vmul.f32 0.032258064, %v3108_v24 }
0x14ea   : > { %4035 = vrsqrt.f32 %v3110_v25  ;;  %vm3128_vm0 = vcmp.eq.f32.partialorder %v3110_v25, inf  ;;  %v3131_v34 = vand.u32 2147483648, %v3110_v25  ;;  %vm3130_vm2 = vcmp.eq.f32.partialorder %v3110_v25, 0.0 }
0x14f0   : > { %v4034_v26 = vpop.eup %4033 }
0x14f1   : > { %v3120_v27 = vmul.f32 %v4034_v26, %v3109_v23 }
0x14f3   : > { %v3122_v29 = vsel %vm3121_vm14, %v3109_v23, %v3120_v27 }
0x14f4   : > { %v4036_v30 = vpop.eup %4035  ;;  %v3125_v31 = vsel %vm3123_vm15, %v3124_v28, %v3122_v29 }
0x14f5   : > { %v3133_v32 = vadd.f32 1e-06, %v3125_v31  ;;  %v3127_v33 = vmul.f32 %v4036_v30, %v3110_v25 }
0x14f7   : > { %4037 = vrcp.f32 %v3133_v32  ;;  %v3129_v36 = vsel %vm3128_vm0, %v3110_v25, %v3127_v33 }
0x14f8   : > { %v3132_v37 = vsel %vm3130_vm2, %v3131_v34, %v3129_v36 }
0x14f9   : > { %v3134_v39 = vadd.f32 1e-06, %v3132_v37 }
0x14fb   : > { %4039 = vrcp.f32 %v3134_v39 }
0x1501   : > { %v4038_v42 = vpop.eup %4037 }
0x1502   : > { %v3136_v44 = vmul.f32 %v4038_v42, %v3117_v41 }
0x1504   : > { %v3145_v46 = vadd.f32 %v3563_v43, %v3136_v44 }
0x1505   : > { %v4040_v47 = vpop.eup %4039 }
0x1506   : > { %3147 = vst.msk [vmem:[#allocation3] sm:$0xff] %vm892_vm1, %v3145_v46  ;;  %v3138_v49 = vmul.f32 %v4040_v47, %v3118_v45 }
0x1508   : > { %v3146_v50 = vadd.f32 %v3563_v43, %v3138_v49 }
0x150a   : > { %3148 = vst.msk [vmem:[#allocation3 + $0x8] sm:$0xff] %vm892_vm1, %v3146_v50 }
0x150b PF: > { %s4747_s30 = sld [smem:[#allocation8_spill]]  ;;  %s4097_s3 = smov [#allocation3]  }
0x150c   : > { %s3158_s29 = sshll.u32 %s4097_s3, 4  ;;  %s3159_s29 = int_to_ptr.vmem [resolvable:$true] %s3158_s29 }
0x150d   : > { %s4041_s5 = scalar_lea.vmem %s3159_s29, 256  ;;  %p4048_p11 = scmp.lt.s32.totalorder %s3159_s29, %s3159_s29 }
0x150e   : > { %p4042_p8 = scmp.ne.s32.totalorder %s3159_s29, %s4041_s5  ;;  %p4049_p12 = scmp.lt.s32.totalorder %s4041_s5, %s4041_s5 }
0x1510   : > { %p4050_p13 = por %p4049_p12, %p4048_p11 }
0x1511   : > { %s4748_s1 = sadd.s32 4294967295, %s4747_s30  }
0x1512   : > { %p4647_p7 = scmp.eq.s32.totalorder %s4748_s1, 1 }
0x1514   : > { %p4043_p9 = pnand %p4042_p8, %p4647_p7 }
0x1516   : > { %p4044_p10 = pneg %p4043_p9 }
0x1518   : > { %p4051_p0 = pnand %p4050_p13, %p4044_p10 }
0x151a   : > { %4054 = shalt.err (!%p4051_p0)
}
0x151b   : > { %s4750_s26 = sld [smem:[#allocation23_spill]] }
0x1521   : > { %s4055_s23 = scalar_lea.hbm %s4750_s26, 256 }
0x1522   : > { %p4056_p1 = scmp.ne.s32.totalorder %s4750_s26, %s4055_s23  ;;  %p4061_p4 = scmp.lt.u32.totalorder %s4055_s23, %s4750_s26 }
0x1524   : > { %p4057_p2 = pnand %p4056_p1, %p4647_p7 }
0x1526   : > { %p4058_p3 = pneg %p4057_p2 }
0x1528   : > { %p4063_p5 = pnand %p4061_p4, %p4058_p3 }
0x152a   : > { %4066 = shalt.err (!%p4063_p5)
}
0x152b   : > { %s4098_s7 = smov 128   ;;  %s4099_s22 = smov 8  }
0x152c   : > { %3919 = dma.vmem_to_hbm [thread:$0]  (%p4647_p7), %s3159_s29, 256, %s4750_s26, [#allocation4], %s4098_s7, %s4098_s7, %s4099_s22  }
0x152d   : > { %4080 = dma.done.wait (%p4647_p7), [#allocation4], 256  }
0x152e   : > { %4082 = vsyncadd (%p4647_p7), [#allocation4], 4294967040 }
0x152f PF: > { %s4751_s25 = sld [smem:[#allocation8_spill]]  ;;  %s4752_s0 = sld [smem:[#allocation7_spill]] }
0x1530   : > { %s4753_s30 = sld [smem:[#allocation9_spill]] }
0x1535   : > { %s30_s20 = sadd.s32 1, %s4751_s25  }
0x1536   : > { %p27_p6 = scmp.ge.s32.totalorder %s30_s20, 4  }
0x1538   :  { %29 = sbr.rel (!%p27_p6) target bundleno = 14 (0xe), region = 201 }
0x153f   :  { %3174 = vsyncpa [#allocation4], 1 }
0x1540   :  { %3176 = vsyncpa [#allocation4 + $0x1], 1 }

</bundles_post_ra>
